<compile_context>
chip_gen: v5e
topology: v5e:2x2
jax: 0.10.0
libtpu: 0.0.40
codegen_flags: <defaults>
</compile_context>

<pallas_src>
import functools

import jax
import jax.numpy as jnp
from jax.experimental import pallas as pl
from jax.experimental.pallas import tpu as pltpu

NUM_HEADS = 4


# ----------------------------------------------------------------------------
# Fused Pallas kernel: one (C_in, TL) tile of the NCL input -> 4 head outputs.
# ----------------------------------------------------------------------------
def _fused_compressor_kernel(x_ref, w1_ref, w2_ref, wd_ref, vin_ref, vout_ref,
                             o0_ref, o1_ref, o2_ref, o3_ref,
                             *, a, b, head_channels, compute_dtype):
    out_refs = (o0_ref, o1_ref, o2_ref, o3_ref)

    x = x_ref[...].astype(jnp.float32)        # (C_in, TL); VPU math in f32
    x_mx = x.astype(compute_dtype)            # MXU operand dtype (f32 or bf16)

    # ---- downsample branch: all 4 heads fused into one matmul --------------
    # wd_ref: (C_tot, C_in) concatenated over heads -> r_all: (C_tot, TL)
    r_all = jnp.dot(wd_ref[...].astype(compute_dtype), x_mx,
                    preferred_element_type=jnp.float32)
    bd = vout_ref[:, 1:2]                      # (C_tot, 1) lane-broadcasts
    bnd_s = vout_ref[:, 2:3]
    bnd_t = vout_ref[:, 3:4]
    r_all = (r_all + bd) * bnd_s + bnd_t       # conv bias, then folded BN

    # ---- main branch, per head (unrolled, 4 heads) --------------------------
    off = 0
    for h, c_out in enumerate(head_channels):
        s1 = vin_ref[:, 5 * h + 0:5 * h + 1]   # (C_in, 1)
        t1 = vin_ref[:, 5 * h + 1:5 * h + 2]
        b1 = vin_ref[:, 5 * h + 2:5 * h + 3]
        s2 = vin_ref[:, 5 * h + 3:5 * h + 4]
        t2 = vin_ref[:, 5 * h + 4:5 * h + 5]

        # bn1 -> relu -> conv1 (k=1); dropout1 is identity in eval mode
        h1 = jnp.maximum(x * s1 + t1, 0.0)
        h1 = jnp.dot(w1_ref[h].astype(compute_dtype), h1.astype(compute_dtype),
                     preferred_element_type=jnp.float32) + b1
        # bn2 -> relu -> conv2 (k=1); dropout2 is identity in eval mode
        h2 = jnp.maximum(h1 * s2 + t2, 0.0)
        w2 = w2_ref[off:off + c_out, :].astype(compute_dtype)
        b2 = vout_ref[off:off + c_out, 0:1]
        h2 = jnp.dot(w2, h2.astype(compute_dtype),
                     preferred_element_type=jnp.float32) + b2

        r = r_all[off:off + c_out, :]
        out_refs[h][...] = (a * r + b * h2).astype(out_refs[h].dtype)
        off += c_out


def _pick_tile_l(L):
    for cand in (2048, 1024, 512, 256, 128):
        if L % cand == 0:
            return cand
    return L  # fall back to a full-extent block (allowed; may use masked stores)


def residual_feature_compressor_fwd(feats, packed, *, a, b, head_channels,
                                    tile_l=None, compute_dtype=jnp.float32):
    """feats: (N, C_in, L) -> tuple of 4 arrays (N, C_out_h, L), NCL in/out."""
    N, C_in, L = feats.shape
    if tile_l is None:
        tile_l = _pick_tile_l(L)
    assert L % tile_l == 0, (L, tile_l)
    grid = (N, L // tile_l)

    w1_all = packed["w1"]    # (4, C_in, C_in)
    w2_all = packed["w2"]    # (C_tot, C_in)
    wd_all = packed["wd"]    # (C_tot, C_in)
    vin = packed["vin"]      # (C_in, 5*4)   [bn1_s, bn1_t, b1, bn2_s, bn2_t] per head
    vout = packed["vout"]    # (C_tot, 4)    [b2, bd, bnd_s, bnd_t]

    in_specs = [
        # Input tile: (C_in, tile_l), long L axis on lanes.
        pl.BlockSpec((None, C_in, tile_l), lambda n, l: (n, 0, l)),
        # Packed parameters: full arrays, constant block index -> resident.
        pl.BlockSpec(w1_all.shape, lambda n, l: (0, 0, 0)),
        pl.BlockSpec(w2_all.shape, lambda n, l: (0, 0)),
        pl.BlockSpec(wd_all.shape, lambda n, l: (0, 0)),
        pl.BlockSpec(vin.shape, lambda n, l: (0, 0)),
        pl.BlockSpec(vout.shape, lambda n, l: (0, 0)),
    ]
    out_shape = tuple(jax.ShapeDtypeStruct((N, c, L), feats.dtype)
                      for c in head_channels)
    out_specs = tuple(pl.BlockSpec((None, c, tile_l), lambda n, l: (n, 0, l))
                      for c in head_channels)

    kernel = functools.partial(
        _fused_compressor_kernel, a=float(a), b=float(b),
        head_channels=tuple(head_channels), compute_dtype=compute_dtype)

    return pl.pallas_call(
        kernel,
        grid=grid,
        in_specs=in_specs,
        out_specs=out_specs,
        out_shape=out_shape,
        compiler_params=pltpu.CompilerParams(
            dimension_semantics=("parallel", "parallel")),
    )(feats, w1_all, w2_all, wd_all, vin, vout)


# ----------------------------------------------------------------------------
# Parameter construction (deterministic, synthetic; eval-mode BN folded).
# ----------------------------------------------------------------------------
def _fold_bn(gamma, beta, mean, var, eps=1e-5):
    scale = gamma / jnp.sqrt(var + eps)
    shift = beta - mean * scale
    return scale, shift


def make_head_params(key, c_in, c_out):
    ks = jax.random.split(key, 9)
    f32 = jnp.float32

    def bn(k, c):
        k1, k2, k3, k4 = jax.random.split(k, 4)
        gamma = 0.5 + jax.random.uniform(k1, (c,), f32)
        beta = 0.1 * jax.random.normal(k2, (c,), f32)
        mean = 0.1 * jax.random.normal(k3, (c,), f32)
        var = 0.5 + jax.random.uniform(k4, (c,), f32)
        return _fold_bn(gamma, beta, mean, var)

    bn1_s, bn1_t = bn(ks[0], c_in)
    bn2_s, bn2_t = bn(ks[1], c_in)
    bnd_s, bnd_t = bn(ks[2], c_out)

    # Conv1d k=1 weights kept in PyTorch (C_out, C_in) orientation.
    w1 = 0.1 * jax.random.normal(ks[3], (c_in, c_in), f32)
    b1 = 0.05 * jax.random.normal(ks[4], (c_in,), f32)
    w2 = 0.1 * jax.random.normal(ks[5], (c_out, c_in), f32)
    b2 = 0.05 * jax.random.normal(ks[6], (c_out,), f32)
    wd = 0.1 * jax.random.normal(ks[7], (c_out, c_in), f32)
    bd = 0.05 * jax.random.normal(ks[8], (c_out,), f32)

    return dict(bn1_scale=bn1_s, bn1_shift=bn1_t, w1=w1, b1=b1,
                bn2_scale=bn2_s, bn2_shift=bn2_t, w2=w2, b2=b2,
                wd=wd, bd=bd, bnd_scale=bnd_s, bnd_shift=bnd_t)


def pack_params(heads, compute_dtype=jnp.float32):
    """Pack the 4 heads' params into 5 kernel-friendly arrays."""
    w1 = jnp.stack([h["w1"] for h in heads], axis=0).astype(compute_dtype)
    w2 = jnp.concatenate([h["w2"] for h in heads], axis=0).astype(compute_dtype)
    wd = jnp.concatenate([h["wd"] for h in heads], axis=0).astype(compute_dtype)
    vin_cols = []
    for h in heads:
        vin_cols += [h["bn1_scale"], h["bn1_shift"], h["b1"],
                     h["bn2_scale"], h["bn2_shift"]]
    vin = jnp.stack(vin_cols, axis=1).astype(jnp.float32)        # (C_in, 5*H)
    vout = jnp.concatenate(
        [jnp.stack([h["b2"], h["bd"], h["bnd_scale"], h["bnd_shift"]], axis=1)
         for h in heads], axis=0).astype(jnp.float32)            # (C_tot, 4)
    return dict(w1=w1, w2=w2, wd=wd, vin=vin, vout=vout)


# ----------------------------------------------------------------------------
# ResidualFeatureCompressor: 4 heads sharing the same input, one fused kernel.
# ----------------------------------------------------------------------------
class ResidualFeatureCompressorPallas:
    def __init__(self, key, in_channels, out_channels_style, out_channels_content,
                 a, b, compression_power, compute_dtype=jnp.float32):
        self.a = float(a)
        self.b = float(b)
        self.compression_power = compression_power  # parity with PyTorch; unused in fwd
        # compute_dtype=jnp.bfloat16 recommended on v6e/v7x (f32 accumulation kept).
        self.compute_dtype = compute_dtype
        self.head_channels = (out_channels_style, out_channels_style,
                              out_channels_content, out_channels_content)
        keys = jax.random.split(key, NUM_HEADS)
        self.heads = [make_head_params(k, in_channels, c)
                      for k, c in zip(keys, self.head_channels)]
        self.packed = pack_params(self.heads, compute_dtype)

    def __call__(self, feats, tile_l=None):
        # feats: (N, C_in, L) float32 (PyTorch NCL) ->
        # (style_mu, style_logvar, content_mu, content_logvar), each (N, C_out, L).
        return residual_feature_compressor_fwd(
            feats, self.packed, a=self.a, b=self.b,
            head_channels=self.head_channels, tile_l=tile_l,
            compute_dtype=self.compute_dtype)


# ----------------------------------------------------------------------------
# Pure-JAX reference (same math, NCL layout) for a correctness check.
# ----------------------------------------------------------------------------
def _ref_head(x, p, a, b):
    hp = jax.lax.Precision.HIGHEST

    def bn(v, s, t):
        return v * s[None, :, None] + t[None, :, None]

    h = jnp.maximum(bn(x, p["bn1_scale"], p["bn1_shift"]), 0.0)
    h = jnp.einsum('oc,ncl->nol', p["w1"], h, precision=hp) + p["b1"][None, :, None]
    h = jnp.maximum(bn(h, p["bn2_scale"], p["bn2_shift"]), 0.0)
    h = jnp.einsum('oc,ncl->nol', p["w2"], h, precision=hp) + p["b2"][None, :, None]
    r = jnp.einsum('oc,ncl->nol', p["wd"], x, precision=hp) + p["bd"][None, :, None]
    r = bn(r, p["bnd_scale"], p["bnd_shift"])
    return a * r + b * h


if __name__ == "__main__":
    key = jax.random.PRNGKey(0)
    k_param, k_x = jax.random.split(key)

    # Small shapes consistent with the module's Conv1d forward: feats is (N, C_in, L).
    N, C_in, L = 2, 32, 256
    out_style, out_content = 8, 16
    a_val, b_val = 2.0, 0.3

    model = ResidualFeatureCompressorPallas(
        k_param, C_in, out_style, out_content,
        a=a_val, b=b_val, compression_power=2)

    feats = jax.random.normal(k_x, (N, C_in, L), jnp.float32)

    # tile_l=128 -> grid (2, 2): exercises the tiled, double-buffered pipeline.
    outs = model(feats, tile_l=128)
    outs = jax.block_until_ready(outs)

    expected_shapes = [(N, out_style, L), (N, out_style, L),
                       (N, out_content, L), (N, out_content, L)]
    for o, p, s in zip(outs, model.heads, expected_shapes):
        r = _ref_head(feats, p, a_val, b_val)
        assert o.shape == s, (o.shape, s)
        assert jnp.allclose(o, r, atol=1e-4, rtol=1e-4), "mismatch vs reference"

    print("KERNEL_OK")
</pallas_src>

<mosaic_0001>
module attributes {stable_mosaic.version = 11 : i64} {
  func.func @_fused_compressor_kernel(%arg0: i32, %arg1: i32, %arg2: memref<1x32x128xf32, #tpu.memory_space<vmem>>, %arg3: memref<4x32x32xf32, #tpu.memory_space<vmem>>, %arg4: memref<48x32xf32, #tpu.memory_space<vmem>>, %arg5: memref<48x32xf32, #tpu.memory_space<vmem>>, %arg6: memref<32x20xf32, #tpu.memory_space<vmem>>, %arg7: memref<48x4xf32, #tpu.memory_space<vmem>>, %arg8: memref<1x8x128xf32, #tpu.memory_space<vmem>>, %arg9: memref<1x8x128xf32, #tpu.memory_space<vmem>>, %arg10: memref<1x16x128xf32, #tpu.memory_space<vmem>>, %arg11: memref<1x16x128xf32, #tpu.memory_space<vmem>>) attributes {dimension_semantics = [#tpu.dimension_semantics<parallel>, #tpu.dimension_semantics<parallel>], iteration_bounds = array<i64: 2, 2>, scalar_prefetch = 0 : i64, scratch_operands = 0 : i64, tpu.core_type = #tpu.core_type<tc>, window_params = [{transform_indices = @transform_0, window_bounds = array<i64: 1, 32, 128>}, {pipeline_mode = #tpu.pipeline_mode<synchronous>, transform_indices = @transform_1, window_bounds = array<i64: 4, 32, 32>}, {pipeline_mode = #tpu.pipeline_mode<synchronous>, transform_indices = @transform_2, window_bounds = array<i64: 48, 32>}, {pipeline_mode = #tpu.pipeline_mode<synchronous>, transform_indices = @transform_3, window_bounds = array<i64: 48, 32>}, {pipeline_mode = #tpu.pipeline_mode<synchronous>, transform_indices = @transform_4, window_bounds = array<i64: 32, 20>}, {pipeline_mode = #tpu.pipeline_mode<synchronous>, transform_indices = @transform_5, window_bounds = array<i64: 48, 4>}, {transform_indices = @transform_6, window_bounds = array<i64: 1, 8, 128>}, {transform_indices = @transform_7, window_bounds = array<i64: 1, 8, 128>}, {transform_indices = @transform_8, window_bounds = array<i64: 1, 16, 128>}, {transform_indices = @transform_9, window_bounds = array<i64: 1, 16, 128>}]} {
    %c0 = arith.constant 0 : index
    %c0_0 = arith.constant 0 : index
    %c0_1 = arith.constant 0 : index
    %0 = vector.load %arg2[%c0, %c0_0, %c0_1] : memref<1x32x128xf32, #tpu.memory_space<vmem>>, vector<1x32x128xf32>
    %1 = vector.shape_cast %0 : vector<1x32x128xf32> to vector<32x128xf32>
    %c0_2 = arith.constant 0 : index
    %c0_3 = arith.constant 0 : index
    %2 = vector.load %arg5[%c0_2, %c0_3] : memref<48x32xf32, #tpu.memory_space<vmem>>, vector<48x32xf32>
    %cst = arith.constant dense<0.000000e+00> : vector<48x128xf32>
    %3 = tpu.matmul %2, %1, %cst {dimension_numbers = #tpu.dot_dimension_numbers<[1], [0], [0], [1], [0, 0, 1, 1], [], []>} : vector<48x32xf32>, vector<32x128xf32>, vector<48x128xf32> -> vector<48x128xf32>
    %c0_4 = arith.constant 0 : index
    %c1 = arith.constant 1 : index
    %4 = vector.load %arg7[%c0_4, %c1] : memref<48x4xf32, #tpu.memory_space<vmem>>, vector<48x1xf32>
    %c0_5 = arith.constant 0 : index
    %c2 = arith.constant 2 : index
    %5 = vector.load %arg7[%c0_5, %c2] : memref<48x4xf32, #tpu.memory_space<vmem>>, vector<48x1xf32>
    %c0_6 = arith.constant 0 : index
    %c3 = arith.constant 3 : index
    %6 = vector.load %arg7[%c0_6, %c3] : memref<48x4xf32, #tpu.memory_space<vmem>>, vector<48x1xf32>
    %7 = vector.broadcast %4 : vector<48x1xf32> to vector<48x128xf32>
    %8 = arith.addf %3, %7 : vector<48x128xf32>
    %9 = vector.broadcast %5 : vector<48x1xf32> to vector<48x128xf32>
    %10 = arith.mulf %8, %9 : vector<48x128xf32>
    %11 = vector.broadcast %6 : vector<48x1xf32> to vector<48x128xf32>
    %12 = arith.addf %10, %11 : vector<48x128xf32>
    %c0_7 = arith.constant 0 : index
    %c0_8 = arith.constant 0 : index
    %13 = vector.load %arg6[%c0_7, %c0_8] : memref<32x20xf32, #tpu.memory_space<vmem>>, vector<32x1xf32>
    %c0_9 = arith.constant 0 : index
    %c1_10 = arith.constant 1 : index
    %14 = vector.load %arg6[%c0_9, %c1_10] : memref<32x20xf32, #tpu.memory_space<vmem>>, vector<32x1xf32>
    %c0_11 = arith.constant 0 : index
    %c2_12 = arith.constant 2 : index
    %15 = vector.load %arg6[%c0_11, %c2_12] : memref<32x20xf32, #tpu.memory_space<vmem>>, vector<32x1xf32>
    %c0_13 = arith.constant 0 : index
    %c3_14 = arith.constant 3 : index
    %16 = vector.load %arg6[%c0_13, %c3_14] : memref<32x20xf32, #tpu.memory_space<vmem>>, vector<32x1xf32>
    %c0_15 = arith.constant 0 : index
    %c4 = arith.constant 4 : index
    %17 = vector.load %arg6[%c0_15, %c4] : memref<32x20xf32, #tpu.memory_space<vmem>>, vector<32x1xf32>
    %18 = vector.broadcast %13 : vector<32x1xf32> to vector<32x128xf32>
    %19 = arith.mulf %1, %18 : vector<32x128xf32>
    %20 = vector.broadcast %14 : vector<32x1xf32> to vector<32x128xf32>
    %21 = arith.addf %19, %20 : vector<32x128xf32>
    %cst_16 = arith.constant 0.000000e+00 : f32
    %22 = vector.broadcast %cst_16 : f32 to vector<32x128xf32>
    %23 = arith.maximumf %21, %22 : vector<32x128xf32>
    %c0_17 = arith.constant 0 : index
    %c0_18 = arith.constant 0 : index
    %c0_19 = arith.constant 0 : index
    %24 = vector.load %arg3[%c0_17, %c0_18, %c0_19] : memref<4x32x32xf32, #tpu.memory_space<vmem>>, vector<1x32x32xf32>
    %25 = vector.shape_cast %24 : vector<1x32x32xf32> to vector<32x32xf32>
    %cst_20 = arith.constant dense<0.000000e+00> : vector<32x128xf32>
    %26 = tpu.matmul %25, %23, %cst_20 {dimension_numbers = #tpu.dot_dimension_numbers<[1], [0], [0], [1], [0, 0, 1, 1], [], []>} : vector<32x32xf32>, vector<32x128xf32>, vector<32x128xf32> -> vector<32x128xf32>
    %27 = vector.broadcast %15 : vector<32x1xf32> to vector<32x128xf32>
    %28 = arith.addf %26, %27 : vector<32x128xf32>
    %29 = vector.broadcast %16 : vector<32x1xf32> to vector<32x128xf32>
    %30 = arith.mulf %28, %29 : vector<32x128xf32>
    %31 = vector.broadcast %17 : vector<32x1xf32> to vector<32x128xf32>
    %32 = arith.addf %30, %31 : vector<32x128xf32>
    %cst_21 = arith.constant 0.000000e+00 : f32
    %33 = vector.broadcast %cst_21 : f32 to vector<32x128xf32>
    %34 = arith.maximumf %32, %33 : vector<32x128xf32>
    %c0_22 = arith.constant 0 : index
    %c0_23 = arith.constant 0 : index
    %35 = vector.load %arg4[%c0_22, %c0_23] : memref<48x32xf32, #tpu.memory_space<vmem>>, vector<8x32xf32>
    %c0_24 = arith.constant 0 : index
    %c0_25 = arith.constant 0 : index
    %36 = vector.load %arg7[%c0_24, %c0_25] : memref<48x4xf32, #tpu.memory_space<vmem>>, vector<8x1xf32>
    %cst_26 = arith.constant dense<0.000000e+00> : vector<8x128xf32>
    %37 = tpu.matmul %35, %34, %cst_26 {dimension_numbers = #tpu.dot_dimension_numbers<[1], [0], [0], [1], [0, 0, 1, 1], [], []>} : vector<8x32xf32>, vector<32x128xf32>, vector<8x128xf32> -> vector<8x128xf32>
    %38 = vector.broadcast %36 : vector<8x1xf32> to vector<8x128xf32>
    %39 = arith.addf %37, %38 : vector<8x128xf32>
    %40 = vector.extract_strided_slice %12 {offsets = [0, 0], sizes = [8, 128], strides = [1, 1]} : vector<48x128xf32> to vector<8x128xf32>
    %cst_27 = arith.constant 2.000000e+00 : f32
    %41 = vector.broadcast %cst_27 : f32 to vector<8x128xf32>
    %42 = arith.mulf %41, %40 : vector<8x128xf32>
    %cst_28 = arith.constant 3.000000e-01 : f32
    %43 = vector.broadcast %cst_28 : f32 to vector<8x128xf32>
    %44 = arith.mulf %43, %39 : vector<8x128xf32>
    %45 = arith.addf %42, %44 : vector<8x128xf32>
    %c0_29 = arith.constant 0 : index
    %c0_30 = arith.constant 0 : index
    %c0_31 = arith.constant 0 : index
    %46 = vector.load %arg8[%c0_29, %c0_30, %c0_31] : memref<1x8x128xf32, #tpu.memory_space<vmem>>, vector<1x8x128xf32>
    %47 = vector.shape_cast %46 : vector<1x8x128xf32> to vector<8x128xf32>
    %48 = vector.shape_cast %45 : vector<8x128xf32> to vector<1x8x128xf32>
    tpu.vector_store %arg8[%c0_29, %c0_30, %c0_31], %48 {strides = array<i32>} : memref<1x8x128xf32, #tpu.memory_space<vmem>>, vector<1x8x128xf32>,
    %c0_32 = arith.constant 0 : index
    %c5 = arith.constant 5 : index
    %49 = vector.load %arg6[%c0_32, %c5] : memref<32x20xf32, #tpu.memory_space<vmem>>, vector<32x1xf32>
    %c0_33 = arith.constant 0 : index
    %c6 = arith.constant 6 : index
    %50 = vector.load %arg6[%c0_33, %c6] : memref<32x20xf32, #tpu.memory_space<vmem>>, vector<32x1xf32>
    %c0_34 = arith.constant 0 : index
    %c7 = arith.constant 7 : index
    %51 = vector.load %arg6[%c0_34, %c7] : memref<32x20xf32, #tpu.memory_space<vmem>>, vector<32x1xf32>
    %c0_35 = arith.constant 0 : index
    %c8 = arith.constant 8 : index
    %52 = vector.load %arg6[%c0_35, %c8] : memref<32x20xf32, #tpu.memory_space<vmem>>, vector<32x1xf32>
    %c0_36 = arith.constant 0 : index
    %c9 = arith.constant 9 : index
    %53 = vector.load %arg6[%c0_36, %c9] : memref<32x20xf32, #tpu.memory_space<vmem>>, vector<32x1xf32>
    %54 = vector.broadcast %49 : vector<32x1xf32> to vector<32x128xf32>
    %55 = arith.mulf %1, %54 : vector<32x128xf32>
    %56 = vector.broadcast %50 : vector<32x1xf32> to vector<32x128xf32>
    %57 = arith.addf %55, %56 : vector<32x128xf32>
    %cst_37 = arith.constant 0.000000e+00 : f32
    %58 = vector.broadcast %cst_37 : f32 to vector<32x128xf32>
    %59 = arith.maximumf %57, %58 : vector<32x128xf32>
    %c1_38 = arith.constant 1 : index
    %c0_39 = arith.constant 0 : index
    %c0_40 = arith.constant 0 : index
    %60 = vector.load %arg3[%c1_38, %c0_39, %c0_40] : memref<4x32x32xf32, #tpu.memory_space<vmem>>, vector<1x32x32xf32>
    %61 = vector.shape_cast %60 : vector<1x32x32xf32> to vector<32x32xf32>
    %cst_41 = arith.constant dense<0.000000e+00> : vector<32x128xf32>
    %62 = tpu.matmul %61, %59, %cst_41 {dimension_numbers = #tpu.dot_dimension_numbers<[1], [0], [0], [1], [0, 0, 1, 1], [], []>} : vector<32x32xf32>, vector<32x128xf32>, vector<32x128xf32> -> vector<32x128xf32>
    %63 = vector.broadcast %51 : vector<32x1xf32> to vector<32x128xf32>
    %64 = arith.addf %62, %63 : vector<32x128xf32>
    %65 = vector.broadcast %52 : vector<32x1xf32> to vector<32x128xf32>
    %66 = arith.mulf %64, %65 : vector<32x128xf32>
    %67 = vector.broadcast %53 : vector<32x1xf32> to vector<32x128xf32>
    %68 = arith.addf %66, %67 : vector<32x128xf32>
    %cst_42 = arith.constant 0.000000e+00 : f32
    %69 = vector.broadcast %cst_42 : f32 to vector<32x128xf32>
    %70 = arith.maximumf %68, %69 : vector<32x128xf32>
    %c8_43 = arith.constant 8 : index
    %c0_44 = arith.constant 0 : index
    %71 = vector.load %arg4[%c8_43, %c0_44] : memref<48x32xf32, #tpu.memory_space<vmem>>, vector<8x32xf32>
    %c8_45 = arith.constant 8 : index
    %c0_46 = arith.constant 0 : index
    %72 = vector.load %arg7[%c8_45, %c0_46] : memref<48x4xf32, #tpu.memory_space<vmem>>, vector<8x1xf32>
    %cst_47 = arith.constant dense<0.000000e+00> : vector<8x128xf32>
    %73 = tpu.matmul %71, %70, %cst_47 {dimension_numbers = #tpu.dot_dimension_numbers<[1], [0], [0], [1], [0, 0, 1, 1], [], []>} : vector<8x32xf32>, vector<32x128xf32>, vector<8x128xf32> -> vector<8x128xf32>
    %74 = vector.broadcast %72 : vector<8x1xf32> to vector<8x128xf32>
    %75 = arith.addf %73, %74 : vector<8x128xf32>
    %76 = vector.extract_strided_slice %12 {offsets = [8, 0], sizes = [8, 128], strides = [1, 1]} : vector<48x128xf32> to vector<8x128xf32>
    %cst_48 = arith.constant 2.000000e+00 : f32
    %77 = vector.broadcast %cst_48 : f32 to vector<8x128xf32>
    %78 = arith.mulf %77, %76 : vector<8x128xf32>
    %cst_49 = arith.constant 3.000000e-01 : f32
    %79 = vector.broadcast %cst_49 : f32 to vector<8x128xf32>
    %80 = arith.mulf %79, %75 : vector<8x128xf32>
    %81 = arith.addf %78, %80 : vector<8x128xf32>
    %c0_50 = arith.constant 0 : index
    %c0_51 = arith.constant 0 : index
    %c0_52 = arith.constant 0 : index
    %82 = vector.load %arg9[%c0_50, %c0_51, %c0_52] : memref<1x8x128xf32, #tpu.memory_space<vmem>>, vector<1x8x128xf32>
    %83 = vector.shape_cast %82 : vector<1x8x128xf32> to vector<8x128xf32>
    %84 = vector.shape_cast %81 : vector<8x128xf32> to vector<1x8x128xf32>
    tpu.vector_store %arg9[%c0_50, %c0_51, %c0_52], %84 {strides = array<i32>} : memref<1x8x128xf32, #tpu.memory_space<vmem>>, vector<1x8x128xf32>,
    %c0_53 = arith.constant 0 : index
    %c10 = arith.constant 10 : index
    %85 = vector.load %arg6[%c0_53, %c10] : memref<32x20xf32, #tpu.memory_space<vmem>>, vector<32x1xf32>
    %c0_54 = arith.constant 0 : index
    %c11 = arith.constant 11 : index
    %86 = vector.load %arg6[%c0_54, %c11] : memref<32x20xf32, #tpu.memory_space<vmem>>, vector<32x1xf32>
    %c0_55 = arith.constant 0 : index
    %c12 = arith.constant 12 : index
    %87 = vector.load %arg6[%c0_55, %c12] : memref<32x20xf32, #tpu.memory_space<vmem>>, vector<32x1xf32>
    %c0_56 = arith.constant 0 : index
    %c13 = arith.constant 13 : index
    %88 = vector.load %arg6[%c0_56, %c13] : memref<32x20xf32, #tpu.memory_space<vmem>>, vector<32x1xf32>
    %c0_57 = arith.constant 0 : index
    %c14 = arith.constant 14 : index
    %89 = vector.load %arg6[%c0_57, %c14] : memref<32x20xf32, #tpu.memory_space<vmem>>, vector<32x1xf32>
    %90 = vector.broadcast %85 : vector<32x1xf32> to vector<32x128xf32>
    %91 = arith.mulf %1, %90 : vector<32x128xf32>
    %92 = vector.broadcast %86 : vector<32x1xf32> to vector<32x128xf32>
    %93 = arith.addf %91, %92 : vector<32x128xf32>
    %cst_58 = arith.constant 0.000000e+00 : f32
    %94 = vector.broadcast %cst_58 : f32 to vector<32x128xf32>
    %95 = arith.maximumf %93, %94 : vector<32x128xf32>
    %c2_59 = arith.constant 2 : index
    %c0_60 = arith.constant 0 : index
    %c0_61 = arith.constant 0 : index
    %96 = vector.load %arg3[%c2_59, %c0_60, %c0_61] : memref<4x32x32xf32, #tpu.memory_space<vmem>>, vector<1x32x32xf32>
    %97 = vector.shape_cast %96 : vector<1x32x32xf32> to vector<32x32xf32>
    %cst_62 = arith.constant dense<0.000000e+00> : vector<32x128xf32>
    %98 = tpu.matmul %97, %95, %cst_62 {dimension_numbers = #tpu.dot_dimension_numbers<[1], [0], [0], [1], [0, 0, 1, 1], [], []>} : vector<32x32xf32>, vector<32x128xf32>, vector<32x128xf32> -> vector<32x128xf32>
    %99 = vector.broadcast %87 : vector<32x1xf32> to vector<32x128xf32>
    %100 = arith.addf %98, %99 : vector<32x128xf32>
    %101 = vector.broadcast %88 : vector<32x1xf32> to vector<32x128xf32>
    %102 = arith.mulf %100, %101 : vector<32x128xf32>
    %103 = vector.broadcast %89 : vector<32x1xf32> to vector<32x128xf32>
    %104 = arith.addf %102, %103 : vector<32x128xf32>
    %cst_63 = arith.constant 0.000000e+00 : f32
    %105 = vector.broadcast %cst_63 : f32 to vector<32x128xf32>
    %106 = arith.maximumf %104, %105 : vector<32x128xf32>
    %c16 = arith.constant 16 : index
    %c0_64 = arith.constant 0 : index
    %107 = vector.load %arg4[%c16, %c0_64] : memref<48x32xf32, #tpu.memory_space<vmem>>, vector<16x32xf32>
    %c16_65 = arith.constant 16 : index
    %c0_66 = arith.constant 0 : index
    %108 = vector.load %arg7[%c16_65, %c0_66] : memref<48x4xf32, #tpu.memory_space<vmem>>, vector<16x1xf32>
    %cst_67 = arith.constant dense<0.000000e+00> : vector<16x128xf32>
    %109 = tpu.matmul %107, %106, %cst_67 {dimension_numbers = #tpu.dot_dimension_numbers<[1], [0], [0], [1], [0, 0, 1, 1], [], []>} : vector<16x32xf32>, vector<32x128xf32>, vector<16x128xf32> -> vector<16x128xf32>
    %110 = vector.broadcast %108 : vector<16x1xf32> to vector<16x128xf32>
    %111 = arith.addf %109, %110 : vector<16x128xf32>
    %112 = vector.extract_strided_slice %12 {offsets = [16, 0], sizes = [16, 128], strides = [1, 1]} : vector<48x128xf32> to vector<16x128xf32>
    %cst_68 = arith.constant 2.000000e+00 : f32
    %113 = vector.broadcast %cst_68 : f32 to vector<16x128xf32>
    %114 = arith.mulf %113, %112 : vector<16x128xf32>
    %cst_69 = arith.constant 3.000000e-01 : f32
    %115 = vector.broadcast %cst_69 : f32 to vector<16x128xf32>
    %116 = arith.mulf %115, %111 : vector<16x128xf32>
    %117 = arith.addf %114, %116 : vector<16x128xf32>
    %c0_70 = arith.constant 0 : index
    %c0_71 = arith.constant 0 : index
    %c0_72 = arith.constant 0 : index
    %118 = vector.load %arg10[%c0_70, %c0_71, %c0_72] : memref<1x16x128xf32, #tpu.memory_space<vmem>>, vector<1x16x128xf32>
    %119 = vector.shape_cast %118 : vector<1x16x128xf32> to vector<16x128xf32>
    %120 = vector.shape_cast %117 : vector<16x128xf32> to vector<1x16x128xf32>
    tpu.vector_store %arg10[%c0_70, %c0_71, %c0_72], %120 {strides = array<i32>} : memref<1x16x128xf32, #tpu.memory_space<vmem>>, vector<1x16x128xf32>,
    %c0_73 = arith.constant 0 : index
    %c15 = arith.constant 15 : index
    %121 = vector.load %arg6[%c0_73, %c15] : memref<32x20xf32, #tpu.memory_space<vmem>>, vector<32x1xf32>
    %c0_74 = arith.constant 0 : index
    %c16_75 = arith.constant 16 : index
    %122 = vector.load %arg6[%c0_74, %c16_75] : memref<32x20xf32, #tpu.memory_space<vmem>>, vector<32x1xf32>
    %c0_76 = arith.constant 0 : index
    %c17 = arith.constant 17 : index
    %123 = vector.load %arg6[%c0_76, %c17] : memref<32x20xf32, #tpu.memory_space<vmem>>, vector<32x1xf32>
    %c0_77 = arith.constant 0 : index
    %c18 = arith.constant 18 : index
    %124 = vector.load %arg6[%c0_77, %c18] : memref<32x20xf32, #tpu.memory_space<vmem>>, vector<32x1xf32>
    %c0_78 = arith.constant 0 : index
    %c19 = arith.constant 19 : index
    %125 = vector.load %arg6[%c0_78, %c19] : memref<32x20xf32, #tpu.memory_space<vmem>>, vector<32x1xf32>
    %126 = vector.broadcast %121 : vector<32x1xf32> to vector<32x128xf32>
    %127 = arith.mulf %1, %126 : vector<32x128xf32>
    %128 = vector.broadcast %122 : vector<32x1xf32> to vector<32x128xf32>
    %129 = arith.addf %127, %128 : vector<32x128xf32>
    %cst_79 = arith.constant 0.000000e+00 : f32
    %130 = vector.broadcast %cst_79 : f32 to vector<32x128xf32>
    %131 = arith.maximumf %129, %130 : vector<32x128xf32>
    %c3_80 = arith.constant 3 : index
    %c0_81 = arith.constant 0 : index
    %c0_82 = arith.constant 0 : index
    %132 = vector.load %arg3[%c3_80, %c0_81, %c0_82] : memref<4x32x32xf32, #tpu.memory_space<vmem>>, vector<1x32x32xf32>
    %133 = vector.shape_cast %132 : vector<1x32x32xf32> to vector<32x32xf32>
    %cst_83 = arith.constant dense<0.000000e+00> : vector<32x128xf32>
    %134 = tpu.matmul %133, %131, %cst_83 {dimension_numbers = #tpu.dot_dimension_numbers<[1], [0], [0], [1], [0, 0, 1, 1], [], []>} : vector<32x32xf32>, vector<32x128xf32>, vector<32x128xf32> -> vector<32x128xf32>
    %135 = vector.broadcast %123 : vector<32x1xf32> to vector<32x128xf32>
    %136 = arith.addf %134, %135 : vector<32x128xf32>
    %137 = vector.broadcast %124 : vector<32x1xf32> to vector<32x128xf32>
    %138 = arith.mulf %136, %137 : vector<32x128xf32>
    %139 = vector.broadcast %125 : vector<32x1xf32> to vector<32x128xf32>
    %140 = arith.addf %138, %139 : vector<32x128xf32>
    %cst_84 = arith.constant 0.000000e+00 : f32
    %141 = vector.broadcast %cst_84 : f32 to vector<32x128xf32>
    %142 = arith.maximumf %140, %141 : vector<32x128xf32>
    %c32 = arith.constant 32 : index
    %c0_85 = arith.constant 0 : index
    %143 = vector.load %arg4[%c32, %c0_85] : memref<48x32xf32, #tpu.memory_space<vmem>>, vector<16x32xf32>
    %c32_86 = arith.constant 32 : index
    %c0_87 = arith.constant 0 : index
    %144 = vector.load %arg7[%c32_86, %c0_87] : memref<48x4xf32, #tpu.memory_space<vmem>>, vector<16x1xf32>
    %cst_88 = arith.constant dense<0.000000e+00> : vector<16x128xf32>
    %145 = tpu.matmul %143, %142, %cst_88 {dimension_numbers = #tpu.dot_dimension_numbers<[1], [0], [0], [1], [0, 0, 1, 1], [], []>} : vector<16x32xf32>, vector<32x128xf32>, vector<16x128xf32> -> vector<16x128xf32>
    %146 = vector.broadcast %144 : vector<16x1xf32> to vector<16x128xf32>
    %147 = arith.addf %145, %146 : vector<16x128xf32>
    %148 = vector.extract_strided_slice %12 {offsets = [32, 0], sizes = [16, 128], strides = [1, 1]} : vector<48x128xf32> to vector<16x128xf32>
    %cst_89 = arith.constant 2.000000e+00 : f32
    %149 = vector.broadcast %cst_89 : f32 to vector<16x128xf32>
    %150 = arith.mulf %149, %148 : vector<16x128xf32>
    %cst_90 = arith.constant 3.000000e-01 : f32
    %151 = vector.broadcast %cst_90 : f32 to vector<16x128xf32>
    %152 = arith.mulf %151, %147 : vector<16x128xf32>
    %153 = arith.addf %150, %152 : vector<16x128xf32>
    %c0_91 = arith.constant 0 : index
    %c0_92 = arith.constant 0 : index
    %c0_93 = arith.constant 0 : index
    %154 = vector.load %arg11[%c0_91, %c0_92, %c0_93] : memref<1x16x128xf32, #tpu.memory_space<vmem>>, vector<1x16x128xf32>
    %155 = vector.shape_cast %154 : vector<1x16x128xf32> to vector<16x128xf32>
    %156 = vector.shape_cast %153 : vector<16x128xf32> to vector<1x16x128xf32>
    tpu.vector_store %arg11[%c0_91, %c0_92, %c0_93], %156 {strides = array<i32>} : memref<1x16x128xf32, #tpu.memory_space<vmem>>, vector<1x16x128xf32>,
    return
  }
  func.func @transform_0(%arg0: i32, %arg1: i32) -> (i32, i32, i32) {
    %c0_i32 = arith.constant 0 : i32
    %c0_i32_0 = arith.constant 0 : i32
    return %arg0, %c0_i32, %arg1 : i32, i32, i32
  }
  func.func @transform_1(%arg0: i32, %arg1: i32) -> (i32, i32, i32) {
    %c0_i32 = arith.constant 0 : i32
    %c0_i32_0 = arith.constant 0 : i32
    %c0_i32_1 = arith.constant 0 : i32
    %c0_i32_2 = arith.constant 0 : i32
    return %c0_i32, %c0_i32_0, %c0_i32_1 : i32, i32, i32
  }
  func.func @transform_2(%arg0: i32, %arg1: i32) -> (i32, i32) {
    %c0_i32 = arith.constant 0 : i32
    %c0_i32_0 = arith.constant 0 : i32
    %c0_i32_1 = arith.constant 0 : i32
    return %c0_i32, %c0_i32_0 : i32, i32
  }
  func.func @transform_3(%arg0: i32, %arg1: i32) -> (i32, i32) {
    %c0_i32 = arith.constant 0 : i32
    %c0_i32_0 = arith.constant 0 : i32
    %c0_i32_1 = arith.constant 0 : i32
    return %c0_i32, %c0_i32_0 : i32, i32
  }
  func.func @transform_4(%arg0: i32, %arg1: i32) -> (i32, i32) {
    %c0_i32 = arith.constant 0 : i32
    %c0_i32_0 = arith.constant 0 : i32
    %c0_i32_1 = arith.constant 0 : i32
    return %c0_i32, %c0_i32_0 : i32, i32
  }
  func.func @transform_5(%arg0: i32, %arg1: i32) -> (i32, i32) {
    %c0_i32 = arith.constant 0 : i32
    %c0_i32_0 = arith.constant 0 : i32
    %c0_i32_1 = arith.constant 0 : i32
    return %c0_i32, %c0_i32_0 : i32, i32
  }
  func.func @transform_6(%arg0: i32, %arg1: i32) -> (i32, i32, i32) {
    %c0_i32 = arith.constant 0 : i32
    %c0_i32_0 = arith.constant 0 : i32
    return %arg0, %c0_i32, %arg1 : i32, i32, i32
  }
  func.func @transform_7(%arg0: i32, %arg1: i32) -> (i32, i32, i32) {
    %c0_i32 = arith.constant 0 : i32
    %c0_i32_0 = arith.constant 0 : i32
    return %arg0, %c0_i32, %arg1 : i32, i32, i32
  }
  func.func @transform_8(%arg0: i32, %arg1: i32) -> (i32, i32, i32) {
    %c0_i32 = arith.constant 0 : i32
    %c0_i32_0 = arith.constant 0 : i32
    return %arg0, %c0_i32, %arg1 : i32, i32, i32
  }
  func.func @transform_9(%arg0: i32, %arg1: i32) -> (i32, i32, i32) {
    %c0_i32 = arith.constant 0 : i32
    %c0_i32_0 = arith.constant 0 : i32
    return %arg0, %c0_i32, %arg1 : i32, i32, i32
  }
}

</mosaic_0001>

<bundles_post_ra>
// kernel: tpu_custom_call.1
= control target key start
LH: loop header
LB: loop body
LE: loop exit
PB: predicated region body
PF: predicated region fallthrough
CT: control target
= control target key end

     0   :  { %s2982_s0 = inlined_call_operand.vmem [shape: f32[2,32,256], index: 0, kind: input, shape index: {}]   ;;  %s2983_s1 = inlined_call_operand.hbm [shape: f32[4,32,32], index: 1, kind: input, shape index: {}]   ;;  %s2984_s2 = inlined_call_operand.vmem [shape: f32[48,32], index: 2, kind: input, shape index: {}]   ;;  %s2985_s3 = inlined_call_operand.vmem [shape: f32[48,32], index: 3, kind: input, shape index: {}]   ;;  %s2986_s4 = inlined_call_operand.vmem [shape: f32[32,20], index: 4, kind: input, shape index: {}]   ;;  %s2987_s5 = inlined_call_operand.vmem [shape: f32[48,4], index: 5, kind: input, shape index: {}]   ;;  %s2988_s6 = inlined_call_operand.hbm [shape: f32[2,8,256], index: 6, kind: output, shape index: {0}]   ;;  %s2989_s7 = inlined_call_operand.hbm [shape: f32[2,8,256], index: 7, kind: output, shape index: {1}]   ;;  %s2990_s8 = inlined_call_operand.hbm [shape: f32[2,16,256], index: 8, kind: output, shape index: {2}]   ;;  %s2991_s9 = inlined_call_operand.hbm [shape: f32[2,16,256], index: 9, kind: output, shape index: {3}]  }
   0x1   :  { %3012 = sst [smem:[#allocation21_spill]] %s2982_s0 }
   0x2   :  { %3013 = sst [smem:[#allocation22_spill]] %s2983_s1 }
   0x3   :  { %3014 = sst [smem:[#allocation23_spill]] %s2984_s2 }
   0x4   :  { %3015 = sst [smem:[#allocation24_spill]] %s2990_s8 }
   0x5   :  { %15 = vsyncpa [#allocation4], 0 }
   0x6   :  { %16 = vsyncpa [#allocation5], 0 }
   0x7   :  { %18 = vsyncpa [#allocation5 + $0x1], 0 }
   0x8   :  { %19 = vsyncpa [#allocation8], 0 }
   0x9   :  { %21 = vsyncpa [#allocation8 + $0x1], 0 }
   0xa   :  { %22 = vsyncpa [#allocation11], 0 }
   0xb   :  { %24 = vsyncpa [#allocation11 + $0x1], 0  ;;  %s2243_s30 = smov 0   ;;  %s2245_s10 = smov 0  }
   0xc   :  { %s2247_s11 = smov 0   ;;  %s2249_s12 = smov 0  }
   0xd   :  { %s2251_s13 = smov 0   ;;  %s2253_s14 = smov 0  }
   0xe   :  { %s2255_s15 = smov 0   ;;  %s2257_s16 = smov 0  }
   0xf LB: > { %3016 = sst [smem:[#allocation16_spill]] %s2137_s30  ;;  %s2284_s17 = sadd.s32 4294967295, %s2165_s16   ;;  %s2165_s16 = sphi %s2257_s16, %s30_s16   ;;  %s2161_s15 = sphi %s2255_s15, %s3052_s15   ;;  %s2157_s14 = sphi %s2253_s14, %s3051_s14   ;;  %s2153_s13 = sphi %s2251_s13, %s3050_s13   ;;  %s2149_s12 = sphi %s2249_s12, %s3049_s12   ;;  %s2145_s11 = sphi %s2247_s11, %s3048_s11   ;;  %s2141_s10 = sphi %s2245_s10, %s3047_s10   ;;  %s2137_s30 = sphi %s2243_s30, %s3046_s30  }
  0x10   : > { %s2992_s18 = sadd.s32 4294967294, %s2165_s16   ;;  %s39_s19 = sadd.s32 1, %s2157_s14 }
  0x11   : > { %s42_s20 = sadd.s32 1, %s2161_s15  ;;  %p40_p0 = scmp.ge.s32.totalorder %s39_s19, 2 }
  0x12   : > { %s51_s21 = sadd.s32 1, %s2145_s11  ;;  %p58_p1 = scmp.ne.s32.totalorder %s2145_s11, %s2141_s10 }
  0x13   : > { %p59_p2 = scmp.eq.s32.totalorder %s2165_s16, 0  ;;  %s3054_s19 = smov (%p40_p0, %s39_s19), 0 }
  0x14   : > { %3017 = sst [smem:[#allocation17_spill]] %s3054_s19  ;;  %s3056_s20 = smov (!%p40_p0, %s42_s20), %s2161_s15 }
  0x15   : > { %s47_s22 = ssub.s32 %s2157_s14, %s3054_s19  ;;  %p2298_p3 = por %p59_p2, %p58_p1 }
  0x16   : > { %p44_p4 = scmp.ge.s32.totalorder %s3056_s20, 2  ;;  %p195_p5 = scmp.eq.s32.totalorder %s2284_s17, 3 }
  0x17   : > { %p200_p6 = scmp.ne.s32.totalorder %s2141_s10, %s2137_s30  ;;  %p201_p7 = scmp.eq.s32.totalorder %s2992_s18, 3 }
  0x18   : > { %s3058_s20 = smov (%p44_p4, %s3056_s20), 0  ;;  %p2309_p8 = por %p195_p5, %p58_p1 }
  0x19   : > { %3019 = sst [smem:[#allocation18_spill]] %s3058_s20  ;;  %p2313_p9 = por %p201_p7, %p200_p6 }
  0x1a   : > { %s46_s26 = ssub.s32 %s2161_s15, %s3058_s20  ;;  %p1689_p10 = scmp.ge.s32.totalorder %s2165_s16, 1 }
  0x1b   : > { %s3021_s25 = scalar_select %p2313_p9, 1, 0 }
  0x1c   : > { %s48_s27 = sor.u32 %s47_s22, %s46_s26  ;;  %p292_p11 = scmp.lt.s32.totalorder %s2165_s16, 5 }
  0x1d   : > { %3022 = sst [smem:[#allocation19_spill]] %s3021_s25  ;;  %p49_p12 = scmp.eq.s32.totalorder %s48_s27, 0 }
  0x1e   : > { %p2321_p13 = pnand %p1689_p10, %p292_p11  ;;  %p1781_p0 = scmp.eq.s32.totalorder %s2284_s17, 0 }
  0x1f   : > { %s2327_s29 = scalar_select %p49_p12, %s2145_s11, %s51_s21  }
  0x20   : > { %p1764_p1 = pneg %p2321_p13  ;;  %s3025_s1 = sld [smem:[#allocation22_spill]] }
  0x21   : > { %3024 = sst [smem:[#allocation20_spill]] %s2327_s29  ;;  %s2167_s20 = smov [#allocation3]  }
  0x22   : > { %s305_s25 = sshll.u32 %s2167_s20, 4  ;;  %p1765_p2 = pnand %p1781_p0, %p1764_p1  ;;  %s306_s25 = int_to_ptr.vmem [resolvable:$true] %s305_s25 }
  0x23   : > { %s2168_s22 = smov 128   ;;  %s2169_s26 = smov 8  }
  0x24   : > { %p1691_p4 = scmp.ge.s32.totalorder %s2165_s16, 4 }
  0x26   : > { %s303_s30 = sshll.u32 %s3025_s1, 4  ;;  %327 = sbr.rel (%p1691_p4) target bundleno = 57 (0x39), region = 36  ;;  %s304_s30 = int_to_ptr.hbm [resolvable:$true] %s303_s30 }
  0x27   : > { %1767 = dma.hbm_to_vmem [thread:$0]  (!%p1765_p2), %s304_s30, 2048, %s306_s25, [#allocation4], %s2168_s22, %s2168_s22, %s2169_s26  }
  0x2b   : > { %330 = sbr.rel (!%p2298_p3) target bundleno = 57 (0x39), region = 40  ;;  %s332_s18 = sand.u32 (%p2298_p3), 1, %s2145_s11  }
  0x2c   : > { %s1693_s19 = sshll.u32 (%p2298_p3), %s2161_s15, 3  ;;  %s1692_s21 = sshll.u32 (%p2298_p3), %s332_s18, 5 }
  0x2d   : > { %s336_s27 = sadd.s32 (%p2298_p3), %s2157_s14, %s1693_s19  ;;  %s3026_s0 = sld [smem:[#allocation21_spill]] (%p2298_p3) }
  0x2e   : > { %s1694_s20 = sshll.u32 (%p2298_p3), %s336_s27, 3  ;;  %s334_s30 = scalar_lea.vmem (%p2298_p3), [#allocation2], %s1692_s21 }
  0x33   : > { %s338_s8 = scalar_lea.vmem %s3026_s0, %s1694_s20 }
  0x34   : > { %v373_v0 = vld [vmem:[%s338_s8] sm:$0xff]  ;;  %v375_v1 = vld [vmem:[%s338_s8 + $0x10] sm:$0xff] }
  0x35   : > { %v377_v2 = vld [vmem:[%s338_s8 + $0x20] sm:$0xff]  ;;  %374 = vst [vmem:[%s334_s30] sm:$0xff] %v373_v0  ;;  %v379_v3 = vld [vmem:[%s338_s8 + $0x30] sm:$0xff] }
  0x36   : > { %376 = vst [vmem:[%s334_s30 + $0x8] sm:$0xff] %v375_v1 }
  0x37   : > { %378 = vst [vmem:[%s334_s30 + $0x10] sm:$0xff] %v377_v2 }
  0x38   : > { %380 = vst [vmem:[%s334_s30 + $0x18] sm:$0xff] %v379_v3 }
  0x39 PF: > { %389 = sbr.rel (%p2321_p13) target bundleno = 842 (0x34a), region = 78  ;;  %s2348_s23 = sand.u32 (!%p2321_p13), 1, %s2141_s10  }
  0x3a   : > { %s1696_s1 = sshll.u32 (!%p2321_p13), %s2348_s23, 5 }
  0x3b   : > { %s394_s25 = scalar_lea.vmem (!%p2321_p13), [#allocation2], %s1696_s1 }
  0x3e   : > { %2120 = dma.done.wait (%p1781_p0), [#allocation4], 2048  }
  0x3f   : > { %2122 = vsyncadd (%p1781_p0), [#allocation4], 4294965248  ;;  %v2998_v4 = vmov 0   ;;  %v2171_v5 = vmov 1   ;;  %v2359_v6 = vld [vmem:[%s2986_s4 + $0x18] sm:$0xff]  ;;  %v2365_v8 = vld [vmem:[%s394_s25 + $0x10] sm:$0xff] }
  0x40   : > { %1874 = vset.pattern.permute.xlu0 %v2998_v4  ;;  %1875 = vset.pattern.permute.xlu1 %v2171_v5  ;;  %v2361_v7 = vld [vmem:[%s394_s25 + $0x18] sm:$0xff]  ;;  %v2370_v9 = vld [vmem:[%s2986_s4 + $0x10] sm:$0xff]  ;;  %v2374_v10 = vld [vmem:[%s394_s25 + $0x8] sm:$0xff]  ;;  %vm493_vm0 = vcmask 261120   ;;  %v2172_v24 = vmov 6   ;;  %v2173_v26 = vmov 5  }
  0x41   : > { %1877 = vset.pattern.permute.xlu2 %v2171_v5  ;;  %648 = vperm.xlu1 %1875, %v2359_v6   ;;  %v2378_v11 = vld [vmem:[%s394_s25] sm:$0xff]  ;;  %v2388_v13 = vld [vmem:[%s2986_s4 + $0x8] sm:$0xff]  ;;  %v453_v17 = vld [vmem:[%s2985_s3 + $0x10] sm:$0xff]  ;;  %v2174_v27 = vmov 2   ;;  %v3000_v29 = vmov 3   ;;  %v2176_v30 = vmov 7  }
  0x42   : > { %628 = vperm.xlu0 %1874, %v2359_v6   ;;  %524 = vmatpush.msra.mxu0 %v2361_v7  ;;  %v451_v12 = vld [vmem:[%s2985_s3] sm:$0xff]  ;;  %v452_v15 = vld [vmem:[%s2985_s3 + $0x8] sm:$0xff]  ;;  %v2422_v18 = vld [vmem:[%s2987_s5 + $0x18] sm:$0xff]  ;;  %v2177_v31 = vmov 4   ;;  %v2178_v33 = vmov 9   ;;  %v2179_v36 = vmov 15  }
  0x43   : > { %644 = vperm.xlu2 %1877, %v2370_v9   ;;  %1744 = vmatpush.msra.mxu1 %v2361_v7  ;;  %v2397_v14 = vld [vmem:[%s2986_s4] sm:$0xff]  ;;  %v2427_v19 = vld [vmem:[%s2987_s5 + $0x8] sm:$0xff]  ;;  %v2433_v20 = vld [vmem:[%s2987_s5 + $0x10] sm:$0xff]  ;;  %v2180_v43 = vmov 10   ;;  %v2181_v51 = vmov 11   ;;  %v3005_v62 = vmov 14  }
  0x44   : > { %525 = vmatpush.msra.mxu0 %v2365_v8  ;;  %v2411_v16 = vld [vmem:[%s2987_s5] sm:$0xff]  ;;  %v454_v21 = vld [vmem:[%s2985_s3 + $0x18] sm:$0xff]  ;;  %v2450_v23 = vld [vmem:[%s2987_s5 + $0x28] sm:$0xff]  ;;  %v2183_v2 = vmov 8   ;;  %s3029_s2 = sld [smem:[#allocation23_spill]]  ;;  %s1698_s27 = sshll.u32 %s2348_s23, 3 }
  0x45   : > { %1745 = vmatpush.msra.mxu1 %v2365_v8  ;;  %v2444_v22 = vld [vmem:[%s2987_s5 + $0x20] sm:$0xff]  ;;  %v456_v28 = vld [vmem:[%s2985_s3 + $0x28] sm:$0xff]  ;;  %s2807_s1 = scalar_lea.vmem [#allocation6], %s1698_s27  ;;  %s2830_s22 = scalar_lea.vmem [#allocation7], %s1698_s27 }
  0x46   : > { %526 = vmatpush.msra.mxu0 %v2374_v10  ;;  %v455_v25 = vld [vmem:[%s2985_s3 + $0x20] sm:$0xff]  ;;  %s3011_s27 = sshll.u32 %s2348_s23, 4  ;;  %s1734_s25 = sshll.u32 %s2153_s13, 1 }
  0x47   : > { %1746 = vmatpush.msra.mxu1 %v2374_v10  ;;  %v659_v61 = vld [vmem:[#allocation3] sm:$0xff]  ;;  %s1434_s8 = sadd.s32 %s2149_s12, %s1734_s25  ;;  %s1738_s28 = sshll.u32 %s2153_s13, 2 }
  0x48   : > { %527 = vmatpush.msra.mxu0 %v2378_v11  ;;  %s2865_s29 = scalar_lea.vmem [#allocation10], %s3011_s27  ;;  %s1735_s18 = sshll.u32 %s1434_s8, 3 }
  0x49   : > { %1702 = vmatmul.msk.f32.vlgmr.msra.gmra.mxu0 %vm493_vm0, %v451_v12  ;;  %1876 = vset.pattern.permute.xlu1 %v2998_v4  ;;  %s1452_s20 = scalar_lea.hbm %s2989_s7, %s1735_s18  ;;  %s2873_s30 = sadd.s32 %s2149_s12, %s1738_s28 }
  0x4a   : > { %623 = vperm.xlu0 %1874, %v2370_v9   ;;  %618 = vperm.xlu1 %1876, %v2388_v13   ;;  %s1413_s13 = sand.u32 1, %s2284_s17   ;;  %s1454_s25 = sshll.u32 %s2830_s22, 4  ;;  %s1455_s25 = int_to_ptr.vmem [resolvable:$true] %s1454_s25 }
  0x4b   : > { %1878 = vset.pattern.permute.xlu2 %v2998_v4  ;;  %1747 = vmatpush.msra.mxu1 %v2378_v11  ;;  %s1456_s27 = sshll.u32 %s1452_s20, 4  ;;  %s1436_s8 = scalar_lea.hbm %s2988_s6, %s1735_s18  ;;  %s1457_s27 = int_to_ptr.hbm [resolvable:$true] %s1456_s27 }
  0x4c   : > { %613 = vperm.xlu2 %1878, %v2397_v14   ;;  %1707 = vmatmul.msk.f32.vlgmr.msra.gmra.mxu1 %vm493_vm0, %v456_v28  ;;  %s2880_s26 = scalar_lea.sflag [#allocation8], %s1413_s13  ;;  %s1989_s19 = sshra.s32 %s1457_s27, 4  ;;  %s1990_s19 = int_to_ptr.hbm [resolvable:$true] %s1989_s19 }
  0x4d   : > { %s1991_s12 = scalar_lea.hbm %s1990_s19, 8  ;;  %s1995_s28 = scalar_lea.hbm %s2989_s7, 32 }
  0x4e   : > { %p1992_p3 = scmp.ne.s32.totalorder %s1990_s19, %s1991_s12  ;;  %p1996_p7 = scmp.lt.s32.totalorder %s1990_s19, %s2989_s7 }
  0x4f   : > { %p1997_p10 = scmp.lt.s32.totalorder %s1995_s28, %s1991_s12 }
  0x50   : > { %p1993_p5 = pnand %p1992_p3, %p2309_p8 }
  0x51   : > { %1703 = vmatmul.msk.f32.gmra.mxu0 %vm493_vm0, %v452_v15  ;;  %v2184_v15 = vmov 13   ;;  %p1998_p11 = por %p1997_p10, %p1996_p7 }
  0x52   : > { %1879 = vset.pattern.permute.xlu0 %v2171_v5  ;;  %1880 = vset.pattern.permute.xlu1 %v2171_v5  ;;  %p1994_p6 = pneg %p1993_p5 }
  0x53   : > { %640 = vperm.xlu0 %1879, %v2388_v13   ;;  %636 = vperm.xlu1 %1880, %v2397_v14  }
  0x54   : > { %1881 = vset.pattern.permute.xlu2 %v2171_v5  ;;  %v660_v5 = vld [vmem:[#allocation3 + $0x8] sm:$0xff]  ;;  %p1999_p12 = pnand %p1998_p11, %p1994_p6 }
  0x55   : > { %465 = vperm.xlu2 %1881, %v2411_v16  }
  0x59   : > { %1704 = vmatmul.msk.f32.gmra.mxu0 %vm493_vm0, %v453_v17 }
  0x5b   : > { %480 = vperm.xlu0 %1879, %v2422_v18   ;;  %470 = vperm.xlu1 %1880, %v2427_v19  }
  0x5d   : > { %475 = vperm.xlu2 %1881, %v2433_v20  }
  0x61   : > { %1705 = vmatmul.msk.f32.gmra.mxu0 %vm493_vm0, %v454_v21 }
  0x63   : > { %1885 = vset.pattern.permute.xlu0 %v2172_v24  ;;  %485 = vperm.xlu1 %1880, %v2444_v22  }
  0x64   : > { %835 = vperm.xlu0 %1885, %v2370_v9  }
  0x65   : > { %490 = vperm.xlu2 %1881, %v2450_v23  }
  0x69   : > { %1706 = vmatmul.msk.f32.gmra.mxu0 %vm493_vm0, %v455_v25 }
  0x6b   : > { %1882 = vset.pattern.permute.xlu1 %v2173_v26 }
  0x6c   : > { %1886 = vset.pattern.permute.xlu0 %v2174_v27  ;;  %819 = vperm.xlu1 %1882, %v2359_v6  }
  0x6d   : > { %548 = vperm.xlu0 %1886, %v2411_v16   ;;  %1883 = vset.pattern.permute.xlu2 %v2173_v26 }
  0x6e   : > { %814 = vperm.xlu2 %1883, %v2370_v9  }
  0x74   : > { %1884 = vset.pattern.permute.xlu1 %v2172_v24 }
  0x75   : > { %672 = vperm.xlu0 %1886, %v2370_v9   ;;  %839 = vperm.xlu1 %1884, %v2359_v6  }
  0x76   : > { %809 = vperm.xlu2 %1883, %v2388_v13  }
  0x7d   : > { %664 = vperm.xlu0 %1886, %v2397_v14   ;;  %1887 = vset.pattern.permute.xlu1 %v2173_v26  ;;  %v661_v26 = vld [vmem:[#allocation3 + $0x10] sm:$0xff] }
  0x7e   : > { %804 = vperm.xlu1 %1887, %v2397_v14   ;;  %1888 = vset.pattern.permute.xlu2 %v2172_v24 }
  0x7f   : > { %831 = vperm.xlu2 %1888, %v2388_v13  }
  0x85   : > { %1893 = vset.pattern.permute.xlu0 %v3000_v29 }
  0x86   : > { %721 = vperm.xlu0 %1893, %v2397_v14   ;;  %1889 = vset.pattern.permute.xlu1 %v2172_v24 }
  0x87   : > { %827 = vperm.xlu1 %1889, %v2397_v14   ;;  %1890 = vset.pattern.permute.xlu2 %v2174_v27 }
  0x88   : > { %676 = vperm.xlu2 %1890, %v2359_v6  }
  0x8e   : > { %1897 = vset.pattern.permute.xlu0 %v2174_v27 }
  0x8f   : > { %560 = vperm.xlu0 %1897, %v2422_v18   ;;  %1891 = vset.pattern.permute.xlu1 %v3000_v29 }
  0x90   : > { %733 = vperm.xlu1 %1891, %v2359_v6   ;;  %668 = vperm.xlu2 %1890, %v2388_v13  }
  0x97   : > { %1900 = vset.pattern.permute.xlu0 %v2176_v30 }
  0x98   : > { %868 = vperm.xlu0 %1900, %v2359_v6   ;;  %729 = vperm.xlu1 %1891, %v2370_v9  }
  0x99   : > { %1892 = vset.pattern.permute.xlu2 %v2177_v31 }
  0x9a   : > { %753 = vperm.xlu2 %1892, %v2359_v6  }
  0x9d   : > { %v645_v32 = vpop.permute.xlu2 %644 }
  0xa0   : > { %1903 = vset.pattern.permute.xlu0 %v2178_v33  ;;  %725 = vperm.xlu1 %1891, %v2388_v13  }
  0xa1   : > { %945 = vperm.xlu0 %1903, %v2359_v6  }
  0xa2   : > { %749 = vperm.xlu2 %1892, %v2370_v9  }
  0xa6   : > { %v614_v34 = vpop.permute.xlu2 %613 }
  0xa7   : > { %v631_v50 = vmul.f32 %v614_v34, %v2378_v11 }
  0xa8   : > { %1894 = vset.pattern.permute.xlu1 %v2177_v31 }
  0xa9   : > { %937 = vperm.xlu0 %1903, %v2388_v13   ;;  %745 = vperm.xlu1 %1894, %v2388_v13  }
  0xaa   : > { %741 = vperm.xlu2 %1892, %v2397_v14  }
  0xaf   : > { %v2491_v35 = vpop.permute.xlu2 %465 }
  0xb1   : > { %1906 = vset.pattern.permute.xlu0 %v2179_v36  ;;  %1895 = vset.pattern.permute.xlu1 %v2174_v27 }
  0xb2   : > { %1220 = vperm.xlu0 %1906, %v2359_v6   ;;  %552 = vperm.xlu1 %1895, %v2427_v19  }
  0xb3   : > { %v649_v38 = vpop.permute.xlu1 %648  ;;  %1896 = vset.pattern.permute.xlu2 %v2174_v27 }
  0xb4   : > { %v629_v37 = vpop.permute.xlu0 %628  ;;  %556 = vperm.xlu2 %1896, %v2433_v20  }
  0xb5   : > { %v634_v39 = vmul.f32 %v629_v37, %v2361_v7 }
  0xb7   : > { %v654_v40 = vadd.f32 %v649_v38, %v634_v39  ;;  %v476_v41 = vpop.permute.xlu2 %475  ;;  %v662_v39 = vld [vmem:[#allocation3 + $0x18] sm:$0xff] }
  0xb9   : > { %v658_v42 = vmax.f32 %v654_v40, 0.0 }
  0xba   : > { %1911 = vset.pattern.permute.xlu0 %v2180_v43  ;;  %564 = vperm.xlu1 %1895, %v2444_v22  }
  0xbb   : > { %1001 = vperm.xlu0 %1911, %v2388_v13   ;;  %703 = vmatpush.msrb.mxu1 %v658_v42 }
  0xbc   : > { %v624_v44 = vpop.permute.xlu0 %623  ;;  %v619_v45 = vpop.permute.xlu1 %618  ;;  %568 = vperm.xlu2 %1896, %v2450_v23  }
  0xbd   : > { %v633_v46 = vmul.f32 %v624_v44, %v2365_v8  ;;  %v632_v52 = vmul.f32 %v619_v45, %v2374_v10 }
  0xbf   : > { %v653_v47 = vadd.f32 %v645_v32, %v633_v46  ;;  %v2503_v48 = vpop.permute.xlu2 %490 }
  0xc1   : > { %v657_v49 = vmax.f32 %v653_v47, 0.0 }
  0xc2   : > { %1898 = vset.pattern.permute.xlu1 %v3000_v29 }
  0xc3   : > { %1916 = vset.pattern.permute.xlu0 %v2181_v51  ;;  %704 = vmatpush.msrb.mxu1 %v657_v49 }
  0xc4   : > { %578 = vperm.xlu1 %1898, %v2411_v16   ;;  %1023 = vperm.xlu0 %1916, %v2388_v13  }
  0xc5   : > { %v641_v53 = vpop.permute.xlu0 %640  ;;  %v637_v54 = vpop.permute.xlu1 %636  ;;  %1899 = vset.pattern.permute.xlu2 %v3000_v29 }
  0xc6   : > { %v652_v55 = vadd.f32 %v641_v53, %v632_v52  ;;  %v651_v56 = vadd.f32 %v637_v54, %v631_v50  ;;  %v529_v57 = vpop.f32.mrf.mxu0  ;;  %582 = vperm.xlu2 %1899, %v2427_v19   ;;  %v3009_v52 = vmov 19  }
  0xc7   : > { %v530_v27 = vadd.f32 %v529_v57, %v2491_v35 }
  0xc8   : > { %v656_v58 = vmax.f32 %v652_v55, 0.0  ;;  %v815_v59 = vpop.permute.xlu2 %814  ;;  %v655_v60 = vmax.f32 %v651_v56, 0.0 }
  0xc9   : > { %v824_v37 = vmul.f32 %v815_v59, %v2365_v8 }
  0xca   : > { %705 = vmatpush.msrb.mxu1 %v656_v58 }
  0xcc   : > { %1901 = vset.pattern.permute.xlu1 %v2176_v30  ;;  %1926 = vset.pattern.permute.xlu0 %v3005_v62 }
  0xcd   : > { %706 = vmatpush.msrb.mxu1 %v655_v60  ;;  %864 = vperm.xlu1 %1901, %v2370_v9   ;;  %v2516_v63 = vpop.permute.xlu1 %470  ;;  %v481_v0 = vpop.permute.xlu0 %480 }
  0xce   : > { %1137 = vperm.xlu0 %1926, %v2359_v6   ;;  %1708 = vmatmul.msk.f32.vlgmr.msrb.gmra.mxu1 %vm493_vm0, %v659_v61  ;;  %v2520_v1 = vpop.f32.mrf.mxu0 }
  0xcf   : > { %1902 = vset.pattern.permute.xlu2 %v2183_v2 }
  0xd0   : > { %v810_v3 = vpop.permute.xlu2 %809  ;;  %925 = vperm.xlu2 %1902, %v2359_v6  }
  0xd1   : > { %v823_v40 = vmul.f32 %v810_v3, %v2374_v10 }
  0xd5   : > { %860 = vperm.xlu1 %1901, %v2388_v13   ;;  %v2524_v12 = vpop.permute.xlu1 %485 }
  0xd6   : > { %1927 = vset.pattern.permute.xlu0 %v2184_v15  ;;  %1709 = vmatmul.msk.f32.gmra.mxu1 %vm493_vm0, %v660_v5  ;;  %v535_v17 = vpop.f32.mrf.mxu0  ;;  %v836_v21 = vpop.permute.xlu0 %835 }
  0xd7   : > { %1117 = vperm.xlu0 %1927, %v2359_v6   ;;  %v2529_v24 = vadd.f32 %v535_v17, %v476_v41  ;;  %v2545_v41 = vadd.f32 %v836_v21, %v824_v37  ;;  %v2186_v17 = vmov 16  }
  0xd8   : > { %921 = vperm.xlu2 %1902, %v2370_v9  }
  0xd9   : > { %v832_v25 = vpop.permute.xlu2 %831  ;;  %v3003_v47 = vmax.f32 %v2545_v41, 0.0 }
  0xda   : > { %v2555_v46 = vadd.f32 %v832_v25, %v823_v40  ;;  %v853_v25 = vld [vmem:[#allocation3 + $0x30] sm:$0xff] }
  0xdc   : > { %v3002_v50 = vmax.f32 %v2555_v46, 0.0 }
  0xdd   : > { %856 = vperm.xlu1 %1901, %v2397_v14  }
  0xde   : > { %1710 = vmatmul.msk.f32.gmra.mxu1 %vm493_vm0, %v661_v26  ;;  %v538_v28 = vpop.f32.mrf.mxu0  ;;  %v820_v30 = vpop.permute.xlu1 %819 }
  0xdf   : > { %1109 = vperm.xlu0 %1927, %v2388_v13   ;;  %v539_v31 = vadd.f32 %v538_v28, %v481_v0  ;;  %v549_v32 = vpop.permute.xlu0 %548  ;;  %v825_v35 = vmul.f32 %v820_v30, %v2361_v7  ;;  %v852_v0 = vld [vmem:[#allocation3 + $0x28] sm:$0xff]  ;;  %v854_v28 = vld [vmem:[#allocation3 + $0x38] sm:$0xff] }
  0xe0   : > { %v2536_v34 = vmul.f32 %v549_v32, %v530_v27  ;;  %917 = vperm.xlu2 %1902, %v2388_v13   ;;  %v544_v32 = vpop.f32.mrf.mxu1 }
  0xe2   : > { %v2540_v38 = vpop.permute.xlu2 %676 }
  0xe5   : > { %1904 = vset.pattern.permute.xlu1 %v2178_v33 }
  0xe6   : > { %1711 = vmatmul.msk.f32.gmra.mxu1 %vm493_vm0, %v662_v39  ;;  %941 = vperm.xlu1 %1904, %v2370_v9   ;;  %v545_v39 = vadd.f32 %v544_v32, %v2503_v48 }
  0xe7   : > { %1105 = vperm.xlu0 %1927, %v2397_v14   ;;  %v2550_v42 = vpop.permute.xlu0 %672  ;;  %v840_v44 = vpop.permute.xlu1 %839 }
  0xe8   : > { %v2552_v45 = vadd.f32 %v840_v44, %v825_v35  ;;  %913 = vperm.xlu2 %1902, %v2397_v14  }
  0xea   : > { %v3004_v33 = vmax.f32 %v2552_v45, 0.0  ;;  %v2559_v49 = vpop.permute.xlu2 %668 }
  0xec   : > { %1748 = vmatpush.msra.mxu3 %v3004_v33 }
  0xee   : > { %933 = vperm.xlu1 %1904, %v2397_v14   ;;  %1749 = vmatpush.msra.mxu3 %v3003_v47 }
  0xef   : > { %1938 = vset.pattern.permute.xlu0 %v3009_v52  ;;  %v2568_v53 = vpop.permute.xlu0 %664 }
  0xf0   : > { %1338 = vperm.xlu0 %1938, %v2388_v13   ;;  %v805_v54 = vpop.permute.xlu1 %804  ;;  %1905 = vset.pattern.permute.xlu2 %v2180_v43 }
  0xf1   : > { %1011 = vperm.xlu2 %1905, %v2359_v6   ;;  %1750 = vmatpush.msra.mxu3 %v3002_v50  ;;  %v822_v56 = vmul.f32 %v805_v54, %v2378_v11  ;;  %v533_v54 = vadd.f32 %v2520_v1, %v2516_v63  ;;  %v2187_v1 = vmov 12  }
  0xf4   : > { %v2575_v55 = vpop.permute.xlu2 %753 }
  0xf6   : > { %1907 = vset.pattern.permute.xlu1 %v2180_v43 }
  0xf7   : > { %1006 = vperm.xlu1 %1907, %v2370_v9  }
  0xf8   : > { %1939 = vset.pattern.permute.xlu0 %v3000_v29  ;;  %v2581_v57 = vpop.permute.xlu0 %721 }
  0xf9   : > { %586 = vperm.xlu0 %1939, %v2433_v20   ;;  %v828_v58 = vpop.permute.xlu1 %827  ;;  %1908 = vset.pattern.permute.xlu2 %v2181_v51 }
  0xfa   : > { %v2585_v59 = vadd.f32 %v828_v58, %v822_v56  ;;  %1031 = vperm.xlu2 %1908, %v2359_v6  }
  0xfc   : > { %v3001_v60 = vmax.f32 %v2585_v59, 0.0  ;;  %v2589_v61 = vpop.permute.xlu2 %749 }
  0xfe   : > { %1751 = vmatpush.msra.mxu3 %v3001_v60 }
  0xff   : > { %1909 = vset.pattern.permute.xlu1 %v2179_v36  ;;  %1714 = vmatmul.msk.f32.vlgmr.msra.gmra.mxu3 %vm493_vm0, %v852_v0  ;;  %v541_v0 = vpop.f32.mrf.mxu0 }
 0x100   : > { %1215 = vperm.xlu1 %1909, %v2370_v9  }
 0x101   : > { %598 = vperm.xlu0 %1939, %v2450_v23   ;;  %v561_v2 = vpop.permute.xlu0 %560 }
 0x102   : > { %v2597_v3 = vmul.f32 %v561_v2, %v539_v31  ;;  %v2599_v5 = vpop.permute.xlu1 %733  ;;  %1910 = vset.pattern.permute.xlu2 %v2186_v17 }
 0x103   : > { %1240 = vperm.xlu2 %1910, %v2359_v6  }
 0x104   : > { %v2602_v21 = vpop.permute.xlu2 %741 }
 0x107   : > { %1715 = vmatmul.msk.f32.gmra.mxu3 %vm493_vm0, %v853_v25 }
 0x108   : > { %1912 = vset.pattern.permute.xlu1 %v2181_v51 }
 0x109   : > { %1027 = vperm.xlu1 %1912, %v2370_v9   ;;  %1944 = vset.pattern.permute.xlu0 %v2998_v4 }
 0x10a   : > { %v2608_v26 = vpop.permute.xlu1 %729  ;;  %v2610_v27 = vpop.permute.xlu0 %868  ;;  %1368 = vperm.xlu0 %1944, %v2450_v23  }
 0x10b   : > { %1913 = vset.pattern.permute.xlu2 %v2179_v36 }
 0x10c   : > { %1210 = vperm.xlu2 %1913, %v2388_v13  }
 0x10e   : > { %v557_v30 = vpop.permute.xlu2 %556 }
 0x10f   : > { %v2616_v31 = vmul.f32 %v557_v30, %v2529_v24  ;;  %1716 = vmatmul.msk.f32.gmra.mxu3 %vm493_vm0, %v854_v28  ;;  %v2188_v30 = vmov 17  }
 0x111   : > { %1914 = vset.pattern.permute.xlu1 %v2186_v17 }
 0x112   : > { %1236 = vperm.xlu1 %1914, %v2370_v9   ;;  %v2620_v37 = vpop.permute.xlu1 %725 }
 0x113   : > { %v2623_v23 = vpop.permute.xlu0 %945 }
 0x114   : > { %1915 = vset.pattern.permute.xlu2 %v2180_v43 }
 0x115   : > { %996 = vperm.xlu2 %1915, %v2397_v14  }
 0x116   : > { %v569_v35 = vpop.permute.xlu2 %568 }
 0x117   : > { %v2627_v40 = vmul.f32 %v569_v35, %v545_v39 }
 0x11a   : > { %1917 = vset.pattern.permute.xlu1 %v2179_v36 }
 0x11b   : > { %1205 = vperm.xlu1 %1917, %v2397_v14   ;;  %v746_v24 = vpop.permute.xlu1 %745  ;;  %v2631_v44 = vpop.permute.xlu0 %937 }
 0x11d   : > { %1918 = vset.pattern.permute.xlu2 %v2186_v17  ;;  %v542_v17 = vadd.f32 %v541_v0, %v2524_v12 }
 0x11e   : > { %1232 = vperm.xlu2 %1918, %v2388_v13  }
 0x120   : > { %v583_v48 = vpop.permute.xlu2 %582 }
 0x123   : > { %1919 = vset.pattern.permute.xlu1 %v2181_v51 }
 0x124   : > { %1019 = vperm.xlu1 %1919, %v2397_v14   ;;  %v553_v43 = vpop.permute.xlu1 %552  ;;  %v1221_v56 = vpop.permute.xlu0 %1220 }
 0x125   : > { %v572_v58 = vmul.f32 %v553_v43, %v533_v54  ;;  %v3007_v43 = vmov 18  }
 0x126   : > { %1228 = vperm.xlu2 %1918, %v2397_v14  }
 0x127   : > { %v2639_v36 = vadd.f32 %v583_v48, %v572_v58 }
 0x12a   : > { %v2641_v2 = vpop.permute.xlu2 %925 }
 0x12c   : > { %1920 = vset.pattern.permute.xlu1 %v3000_v29  ;;  %v565_v25 = vpop.permute.xlu1 %564 }
 0x12d   : > { %v2645_v63 = vmul.f32 %v565_v25, %v542_v17  ;;  %590 = vperm.xlu1 %1920, %v2422_v18   ;;  %v2648_v51 = vpop.permute.xlu0 %1001 }
 0x12e   : > { %1921 = vset.pattern.permute.xlu2 %v2187_v1 }
 0x12f   : > { %1060 = vperm.xlu2 %1921, %v2359_v6  }
 0x132   : > { %v2651_v28 = vpop.permute.xlu2 %921 }
 0x135   : > { %1922 = vset.pattern.permute.xlu1 %v2188_v30 }
 0x136   : > { %1269 = vperm.xlu1 %1922, %v2359_v6   ;;  %v579_v12 = vpop.permute.xlu1 %578  ;;  %v2654_v32 = vpop.permute.xlu0 %1023 }
 0x137   : > { %v2657_v39 = vadd.f32 %v579_v12, %v2536_v34  ;;  %1056 = vperm.xlu2 %1921, %v2370_v9  }
 0x13a   : > { %v2660_v18 = vpop.permute.xlu2 %917 }
 0x13e   : > { %1265 = vperm.xlu1 %1922, %v2370_v9  }
 0x13f   : > { %v2663_v35 = vpop.permute.xlu1 %864  ;;  %1923 = vset.pattern.permute.xlu2 %v3007_v43 }
 0x140   : > { %v2665_v48 = vpop.permute.xlu0 %1137  ;;  %1326 = vperm.xlu2 %1923, %v2359_v6  }
 0x142   : > { %v2667_v54 = vpop.permute.xlu2 %913 }
 0x146   : > { %1924 = vset.pattern.permute.xlu1 %v2187_v1 }
 0x147   : > { %1052 = vperm.xlu1 %1924, %v2388_v13   ;;  %v2672_v34 = vpop.permute.xlu1 %860 }
 0x148   : > { %1925 = vset.pattern.permute.xlu2 %v2184_v15 }
 0x149   : > { %v2674_v58 = vpop.permute.xlu0 %1117  ;;  %1113 = vperm.xlu2 %1925, %v2370_v9  }
 0x14b   : > { %v708_v0 = vpop.f32.mrf.mxu1  ;;  %v1012_v17 = vpop.permute.xlu2 %1011 }
 0x14c   : > { %v1017_v4 = vmul.f32 %v1012_v17, %v2361_v7 }
 0x14f   : > { %1928 = vset.pattern.permute.xlu1 %v2188_v30  ;;  %v2677_v25 = vpop.permute.xlu1 %856 }
 0x150   : > { %1261 = vperm.xlu1 %1928, %v2388_v13  }
 0x151   : > { %v2681_v12 = vpop.permute.xlu0 %1109  ;;  %1929 = vset.pattern.permute.xlu2 %v3007_v43 }
 0x152   : > { %1322 = vperm.xlu2 %1929, %v2370_v9  }
 0x153   : > { %v711_v29 = vpop.f32.mrf.mxu1 }
 0x154   : > { %v712_v60 = vadd.f32 %v711_v29, %v2559_v49  ;;  %v1032_v50 = vpop.permute.xlu2 %1031  ;;  %v1226_v29 = vmul.f32 %v1221_v56, %v2361_v7  ;;  %v709_v7 = vadd.f32 %v708_v0, %v2568_v53 }
 0x155   : > { %v2685_v47 = vadd.f32 %v1032_v50, %v1017_v4 }
 0x156   : > { %v737_v33 = vmul.f32 %v2620_v37, %v712_v60 }
 0x158   : > { %1930 = vset.pattern.permute.xlu1 %v3009_v52  ;;  %v2690_v15 = vpop.permute.xlu1 %941  ;;  %v757_v62 = vadd.f32 %v746_v24, %v737_v33  ;;  %v3027_v52 = vmov 14  }
 0x159   : > { %1346 = vperm.xlu1 %1930, %v2359_v6   ;;  %v2694_v17 = vpop.permute.xlu0 %1105 }
 0x15a   : > { %1931 = vset.pattern.permute.xlu2 %v2187_v1  ;;  %v736_v1 = vmul.f32 %v2581_v57, %v709_v7  ;;  %v851_v7 = vld [vmem:[#allocation3 + $0x20] sm:$0xff] }
 0x15b   : > { %v714_v49 = vpop.f32.mrf.mxu1  ;;  %1048 = vperm.xlu2 %1931, %v2397_v14  }
 0x15c   : > { %v715_v60 = vadd.f32 %v714_v49, %v2550_v42  ;;  %v756_v57 = vadd.f32 %v2602_v21, %v736_v1 }
 0x15d   : > { %v1241_v4 = vpop.permute.xlu2 %1240 }
 0x15e   : > { %v1246_v50 = vadd.f32 %v1241_v4, %v1226_v29  ;;  %v738_v24 = vmul.f32 %v2608_v26, %v715_v60  ;;  %v760_v26 = vmax.f32 %v756_v57, 0.0  ;;  %v3030_v60 = vmov 19  }
 0x160   : > { %v2698_v37 = vpop.permute.xlu1 %933  ;;  %v1250_v43 = vmax.f32 %v1246_v50, 0.0  ;;  %v758_v49 = vadd.f32 %v2589_v61, %v738_v24  ;;  %v3028_v50 = vmov 18  }
 0x161   : > { %1932 = vset.pattern.permute.xlu1 %v3027_v52 }
 0x162   : > { %1133 = vperm.xlu1 %1932, %v2370_v9   ;;  %v2703_v6 = vpop.permute.xlu0 %1338  ;;  %1296 = vmatpush.msrb.mxu3 %v1250_v43 }
 0x163   : > { %v717_v33 = vpop.f32.mrf.mxu1  ;;  %1933 = vset.pattern.permute.xlu2 %v2188_v30  ;;  %v764_v30 = vld [vmem:[%s3029_s2] sm:$0xff] }
 0x164   : > { %v718_v42 = vadd.f32 %v717_v33, %v2540_v38  ;;  %1257 = vperm.xlu2 %1933, %v2397_v14   ;;  %v3033_v33 = vmax.f32 %v2555_v46, 0.0 }
 0x166   : > { %v739_v56 = vmul.f32 %v2599_v5, %v718_v42  ;;  %v762_v5 = vmax.f32 %v758_v49, 0.0  ;;  %v1211_v61 = vpop.permute.xlu2 %1210  ;;  %v3034_v42 = vmax.f32 %v2585_v59, 0.0  ;;  %v3035_v59 = vmov 3  }
 0x168   : > { %v759_v29 = vadd.f32 %v2575_v55, %v739_v56  ;;  %v761_v55 = vmax.f32 %v757_v62, 0.0  ;;  %v3032_v62 = vmax.f32 %v2545_v41, 0.0 }
 0x169   : > { %v1007_v4 = vpop.permute.xlu1 %1006 }
 0x16a   : > { %1934 = vset.pattern.permute.xlu1 %v3028_v50  ;;  %v763_v43 = vmax.f32 %v759_v29, 0.0  ;;  %v1016_v21 = vmul.f32 %v1007_v4, %v2365_v8 }
 0x16b   : > { %v587_v53 = vpop.permute.xlu0 %586  ;;  %1318 = vperm.xlu1 %1934, %v2388_v13  }
 0x16c   : > { %v2716_v38 = vadd.f32 %v587_v53, %v2616_v31  ;;  %786 = vmatpush.msra.mxu2 %v763_v43  ;;  %1935 = vset.pattern.permute.xlu2 %v3030_v60  ;;  %v3031_v31 = vmax.f32 %v2552_v45, 0.0  ;;  %v3036_v53 = vmov 0  }
 0x16d   : > { %1342 = vperm.xlu2 %1935, %v2370_v9   ;;  %v1224_v9 = vmul.f32 %v1211_v61, %v2374_v10 }
 0x16e   : > { %787 = vmatpush.msra.mxu2 %v762_v5 }
 0x16f   : > { %v997_v24 = vpop.permute.xlu2 %996 }
 0x170   : > { %788 = vmatpush.msra.mxu2 %v761_v55 }
 0x172   : > { %789 = vmatpush.msra.mxu2 %v760_v26  ;;  %v1216_v0 = vpop.permute.xlu1 %1215 }
 0x173   : > { %1712 = vmatmul.msk.f32.vlgmr.msra.gmra.mxu2 %vm493_vm0, %v764_v30  ;;  %1936 = vset.pattern.permute.xlu1 %v3027_v52  ;;  %v1225_v41 = vmul.f32 %v1216_v0, %v2365_v8  ;;  %v1252_v30 = vld [vmem:[#allocation3 + $0x60] sm:$0xff] }
 0x174   : > { %895 = vmatpush.msrb.mxu2 %v3031_v31  ;;  %1129 = vperm.xlu1 %1936, %v2388_v13  }
 0x175   : > { %1937 = vset.pattern.permute.xlu2 %v3028_v50 }
 0x176   : > { %896 = vmatpush.msrb.mxu2 %v3032_v62  ;;  %1314 = vperm.xlu2 %1937, %v2397_v14  }
 0x178   : > { %897 = vmatpush.msrb.mxu2 %v3033_v33  ;;  %v1233_v46 = vpop.permute.xlu2 %1232  ;;  %v1253_v33 = vld [vmem:[#allocation3 + $0x68] sm:$0xff] }
 0x179   : > { %v1244_v56 = vadd.f32 %v1233_v46, %v1224_v9 }
 0x17a   : > { %898 = vmatpush.msrb.mxu2 %v3034_v42 }
 0x17b   : > { %1713 = vmatmul.msk.f32.vlgmr.msrb.gmra.mxu2 %vm493_vm0, %v851_v7  ;;  %v1028_v45 = vpop.permute.xlu1 %1027  ;;  %v1248_v50 = vmax.f32 %v1244_v56, 0.0 }
 0x17c   : > { %1125 = vperm.xlu1 %1936, %v2397_v14   ;;  %v2738_v13 = vadd.f32 %v1028_v45, %v1016_v21 }
 0x17e   : > { %1940 = vset.pattern.permute.xlu2 %v3030_v60  ;;  %v1014_v60 = vmul.f32 %v997_v24, %v2378_v11 }
 0x17f   : > { %1334 = vperm.xlu2 %1940, %v2397_v14  }
 0x180   : > { %v1229_v57 = vpop.permute.xlu2 %1228 }
 0x182   : > { %v903_v52 = vpop.f32.mrf.mxu3 }
 0x183   : > { %v904_v49 = vadd.f32 %v903_v52, %v2672_v34 }
 0x184   : > { %1941 = vset.pattern.permute.xlu1 %v3035_v59  ;;  %v1237_v1 = vpop.permute.xlu1 %1236 }
 0x185   : > { %594 = vperm.xlu1 %1941, %v2444_v22   ;;  %v1245_v29 = vadd.f32 %v1237_v1, %v1225_v41  ;;  %v929_v8 = vmul.f32 %v2660_v18, %v904_v49 }
 0x187   : > { %v1249_v4 = vmax.f32 %v1245_v29, 0.0  ;;  %v949_v61 = vadd.f32 %v2631_v44, %v929_v8  ;;  %1942 = vset.pattern.permute.xlu2 %v3036_v53 }
 0x188   : > { %960 = vperm.xlu2 %1942, %v2427_v19  }
 0x189   : > { %1297 = vmatpush.msrb.mxu3 %v1249_v4 }
 0x18a   : > { %v906_v43 = vpop.f32.mrf.mxu3 }
 0x18b   : > { %1298 = vmatpush.msrb.mxu3 %v1248_v50  ;;  %v907_v55 = vadd.f32 %v906_v43, %v2663_v35 }
 0x18d   : > { %1943 = vset.pattern.permute.xlu1 %v3036_v53  ;;  %v1206_v5 = vpop.permute.xlu1 %1205  ;;  %v930_v18 = vmul.f32 %v2651_v28, %v907_v55  ;;  %v794_v55 = vmul.f32 2.0, %v2657_v39 }
 0x18e   : > { %v1223_v34 = vmul.f32 %v1206_v5, %v2378_v11  ;;  %768 = vperm.xlu1 %1943, %v2411_v16   ;;  %v953_v11 = vmax.f32 %v949_v61, 0.0 }
 0x18f   : > { %v950_v16 = vadd.f32 %v2690_v15, %v930_v18  ;;  %v1254_v15 = vld [vmem:[#allocation3 + $0x70] sm:$0xff] }
 0x190   : > { %v1243_v14 = vadd.f32 %v1229_v57, %v1223_v34  ;;  %1154 = vperm.xlu2 %1942, %v2433_v20   ;;  %v1255_v20 = vld [vmem:[#allocation3 + $0x78] sm:$0xff]  ;;  %v1015_v57 = vmul.f32 %v2648_v51, %v2374_v10  ;;  %v1040_v10 = vmax.f32 %v2738_v13, 0.0 }
 0x191   : > { %v954_v21 = vmax.f32 %v950_v16, 0.0 }
 0x192   : > { %v1247_v26 = vmax.f32 %v1243_v14, 0.0  ;;  %v909_v0 = vpop.f32.mrf.mxu3  ;;  %v1035_v18 = vadd.f32 %v2654_v32, %v1015_v57 }
 0x193   : > { %v910_v35 = vadd.f32 %v909_v0, %v2610_v27  ;;  %v1045_v0 = vld [vmem:[#allocation3 + $0x50] sm:$0xff] }
 0x194   : > { %1299 = vmatpush.msrb.mxu3 %v1247_v26  ;;  %v1039_v51 = vmax.f32 %v1035_v18, 0.0  ;;  %v1043_v26 = vld [vmem:[#allocation3 + $0x40] sm:$0xff] }
 0x195   : > { %1724 = vmatmul.msk.f32.vlgmr.msrb.gmra.mxu3 %vm493_vm0, %v1252_v30  ;;  %v931_v44 = vmul.f32 %v2641_v2, %v910_v35  ;;  %v1046_v35 = vld [vmem:[#allocation3 + $0x58] sm:$0xff] }
 0x196   : > { %v1020_v31 = vpop.permute.xlu1 %1019 }
 0x197   : > { %v1034_v62 = vadd.f32 %v1020_v31, %v1014_v60  ;;  %v951_v19 = vadd.f32 %v2623_v23, %v931_v44 }
 0x198   : > { %1363 = vperm.xlu2 %1942, %v2444_v22  }
 0x199   : > { %v955_v28 = vmax.f32 %v951_v19, 0.0 }
 0x19b   : > { %978 = vmatpush.msra.mxu2 %v955_v28 }
 0x19d   : > { %1725 = vmatmul.msk.f32.gmra.mxu3 %vm493_vm0, %v1253_v33  ;;  %979 = vmatpush.msra.mxu2 %v954_v21 }
 0x19f   : > { %v591_v27 = vpop.permute.xlu1 %590  ;;  %980 = vmatpush.msra.mxu2 %v953_v11 }
 0x1a0   : > { %v2767_v2 = vadd.f32 %v591_v27, %v2597_v3  ;;  %v2780_v3 = vpop.permute.xlu2 %1060 }
 0x1a5   : > { %1726 = vmatmul.msk.f32.gmra.mxu3 %vm493_vm0, %v1254_v15 }
 0x1a8   : > { %v2771_v23 = vpop.permute.xlu1 %1269  ;;  %v2782_v41 = vpop.permute.xlu2 %1056 }
 0x1ad   : > { %1727 = vmatmul.msk.f32.gmra.mxu3 %vm493_vm0, %v1255_v20 }
 0x1b0   : > { %v1266_v7 = vpop.permute.xlu1 %1265  ;;  %v1327_v56 = vpop.permute.xlu2 %1326 }
 0x1b8   : > { %v2791_v49 = vpop.permute.xlu2 %1113 }
 0x1b9   : > { %v2774_v24 = vpop.permute.xlu1 %1052 }
 0x1c0   : > { %v1323_v5 = vpop.permute.xlu2 %1322 }
 0x1c2   : > { %v1262_v42 = vpop.permute.xlu1 %1261 }
 0x1c8   : > { %v1049_v39 = vpop.permute.xlu2 %1048 }
 0x1cb   : > { %v2776_v45 = vpop.permute.xlu1 %1346 }
 0x1d0   : > { %v1258_v32 = vpop.permute.xlu2 %1257 }
 0x1d4   : > { %v2778_v9 = vpop.permute.xlu1 %1133 }
 0x1d8   : > { %v1343_v13 = vpop.permute.xlu2 %1342 }
 0x1dd   : > { %v1319_v22 = vpop.permute.xlu1 %1318 }
 0x1e0   : > { %v1315_v16 = vpop.permute.xlu2 %1314 }
 0x1e6   : > { %v2784_v46 = vpop.permute.xlu1 %1129 }
 0x1ee   : > { %v2786_v52 = vpop.permute.xlu1 %1125 }
 0x1f6   : > { %v791_v59 = vpop.f32.mrf.mxu2 }
 0x1f7   : > { %v595_v1 = vpop.permute.xlu1 %594 }
 0x1f8   : > { %v2789_v29 = vadd.f32 %v595_v1, %v2645_v63 }
 0x1fe   : > { %v900_v4 = vpop.f32.mrf.mxu2 }
 0x1ff   : > { %v901_v50 = vadd.f32 %v900_v4, %v2677_v25  ;;  %v956_v25 = vld [vmem:[%s3029_s2 + $0x8] sm:$0xff] }
 0x200   : > { %v769_v8 = vpop.permute.xlu1 %768 }
 0x201   : > { %v928_v43 = vmul.f32 %v2667_v54, %v901_v50  ;;  %v792_v53 = vadd.f32 %v791_v59, %v769_v8  ;;  %v1041_v54 = vmax.f32 %v2685_v47, 0.0  ;;  %v1044_v47 = vld [vmem:[#allocation3 + $0x48] sm:$0xff]  ;;  %v1335_v59 = vpop.permute.xlu2 %1334 }
 0x203   : > { %v795_v61 = vmul.f32 0.3, %v792_v53  ;;  %v948_v63 = vadd.f32 %v2698_v37, %v928_v43  ;;  %v1038_v37 = vmax.f32 %v1034_v62, 0.0  ;;  %v986_v53 = vmul.f32 2.0, %v2639_v36 }
 0x205   : > { %v796_v34 = vadd.f32 %v795_v61, %v794_v55  ;;  %v952_v14 = vmax.f32 %v948_v63, 0.0 }
 0x207   : > { %981 = vmatpush.msra.mxu2 %v952_v14  ;;  %797 = vst [vmem:[%s2807_s1] sm:$0xff] %v796_v34  ;;  %v1151_v34 = vld [vmem:[%s2987_s5 + $0x18] sm:$0xff] }
 0x208   : > { %1717 = vmatmul.msk.f32.vlgmr.msra.gmra.mxu2 %vm493_vm0, %v956_v25  ;;  %1159 = vperm.xlu1 %1943, %v1151_v34  }
 0x209   : > { %1087 = vmatpush.msrb.mxu2 %v1041_v54 }
 0x20b   : > { %1088 = vmatpush.msrb.mxu2 %v1040_v10 }
 0x20d   : > { %1089 = vmatpush.msrb.mxu2 %v1039_v51 }
 0x20f   : > { %1090 = vmatpush.msrb.mxu2 %v1038_v37 }
 0x210   : > { %1718 = vmatmul.msk.f32.vlgmr.msrb.gmra.mxu2 %vm493_vm0, %v1043_v26 }
 0x218   : > { %1719 = vmatmul.msk.f32.gmra.mxu2 %vm493_vm0, %v1044_v47  ;;  %v1301_v30 = vpop.f32.mrf.mxu3 }
 0x219   : > { %v1302_v19 = vadd.f32 %v1301_v30, %v1258_v32 }
 0x21b   : > { %v1329_v20 = vmul.f32 %v1315_v16, %v1302_v19 }
 0x21d   : > { %v1349_v43 = vadd.f32 %v1335_v59, %v1329_v20 }
 0x220   : > { %1720 = vmatmul.msk.f32.gmra.mxu2 %vm493_vm0, %v1045_v0  ;;  %v1304_v60 = vpop.f32.mrf.mxu3 }
 0x221   : > { %v1305_v62 = vadd.f32 %v1304_v60, %v1262_v42  ;;  %v1353_v42 = vmax.f32 %v1349_v43, 0.0  ;;  %v1149_v60 = vld [vmem:[%s3029_s2 + $0x18] sm:$0xff] }
 0x223   : > { %v1330_v33 = vmul.f32 %v1319_v22, %v1305_v62 }
 0x225   : > { %v1350_v4 = vadd.f32 %v2703_v6, %v1330_v33  ;;  %v1358_v6 = vld [vmem:[%s3029_s2 + $0x28] sm:$0xff] }
 0x228   : > { %1721 = vmatmul.msk.f32.gmra.mxu2 %vm493_vm0, %v1046_v35  ;;  %v1307_v44 = vpop.f32.mrf.mxu3 }
 0x229   : > { %v1308_v31 = vadd.f32 %v1307_v44, %v1266_v7  ;;  %v1354_v7 = vmax.f32 %v1350_v4, 0.0 }
 0x22b   : > { %v1331_v28 = vmul.f32 %v1323_v5, %v1308_v31 }
 0x22d   : > { %v1351_v27 = vadd.f32 %v1343_v13, %v1331_v28 }
 0x22f   : > { %v1355_v50 = vmax.f32 %v1351_v27, 0.0 }
 0x230   : > { %v1310_v21 = vpop.f32.mrf.mxu3 }
 0x231   : > { %v1311_v11 = vadd.f32 %v1310_v21, %v2771_v23  ;;  %v1357_v23 = vld [vmem:[%s3029_s2 + $0x20] sm:$0xff] }
 0x233   : > { %v1332_v15 = vmul.f32 %v1327_v56, %v1311_v11 }
 0x235   : > { %v1352_v1 = vadd.f32 %v2776_v45, %v1332_v15  ;;  %v961_v45 = vpop.permute.xlu2 %960 }
 0x237   : > { %v1356_v8 = vmax.f32 %v1352_v1, 0.0 }
 0x239   : > { %1389 = vmatpush.msrb.mxu0 %v1356_v8 }
 0x23b   : > { %1390 = vmatpush.msrb.mxu0 %v1355_v50 }
 0x23d   : > { %1391 = vmatpush.msrb.mxu0 %v1354_v7  ;;  %v2845_v30 = vpop.permute.xlu2 %1154 }
 0x23f   : > { %1392 = vmatpush.msrb.mxu0 %v1353_v42 }
 0x240   : > { %1728 = vmatmul.msk.f32.vlgmr.msrb.gmra.mxu0 %vm493_vm0, %v1357_v23 }
 0x248   : > { %1729 = vmatmul.msk.f32.gmra.mxu0 %vm493_vm0, %v1358_v6 }
 0x28b   : > { %v983_v22 = vpop.f32.mrf.mxu2 }
 0x28c   : > { %v984_v56 = vadd.f32 %v983_v22, %v961_v45 }
 0x28e   : > { %v987_v5 = vmul.f32 0.3, %v984_v56 }
 0x290   : > { %v988_v57 = vadd.f32 %v987_v5, %v986_v53 }
 0x292   : > { %989 = vst [vmem:[%s2830_s22] sm:$0xff] %v988_v57 }
 0x293   : > { %v1092_v55 = vpop.f32.mrf.mxu2 }
 0x294   : > { %v1093_v18 = vadd.f32 %v1092_v55, %v1049_v39  ;;  %v1400_v39 = vmul.f32 2.0, %v2789_v29 }
 0x296   : > { %v1120_v26 = vmul.f32 %v2694_v17, %v1093_v18  ;;  %v599_v17 = vpop.permute.xlu0 %598 }
 0x297   : > { %v606_v44 = vadd.f32 %v599_v17, %v2627_v40 }
 0x299   : > { %v1401_v40 = vmul.f32 2.0, %v606_v44 }
 0x29b   : > { %v1095_v61 = vpop.f32.mrf.mxu2 }
 0x29c   : > { %v1096_v25 = vadd.f32 %v1095_v61, %v2774_v24 }
 0x29e   : > { %v1121_v51 = vmul.f32 %v2681_v12, %v1096_v25  ;;  %v1369_v35 = vpop.permute.xlu0 %1368 }
 0x2a3   : > { %v1098_v63 = vpop.f32.mrf.mxu2 }
 0x2a4   : > { %v1099_v14 = vadd.f32 %v1098_v63, %v2782_v41  ;;  %v1141_v41 = vadd.f32 %v2784_v46, %v1121_v51 }
 0x2a6   : > { %v1122_v54 = vmul.f32 %v2791_v49, %v1099_v14  ;;  %v1145_v12 = vmax.f32 %v1141_v41, 0.0 }
 0x2a8   : > { %v1142_v32 = vadd.f32 %v2778_v9, %v1122_v54  ;;  %v1364_v9 = vpop.permute.xlu2 %1363 }
 0x2aa   : > { %v1146_v49 = vmax.f32 %v1142_v32, 0.0 }
 0x2ab   : > { %v1101_v36 = vpop.f32.mrf.mxu2 }
 0x2ac   : > { %v1102_v10 = vadd.f32 %v1101_v36, %v2780_v3  ;;  %v1140_v3 = vadd.f32 %v2786_v52, %v1120_v26 }
 0x2ae   : > { %v1123_v37 = vmul.f32 %v2674_v58, %v1102_v10  ;;  %v1144_v58 = vmax.f32 %v1140_v3, 0.0 }
 0x2b0   : > { %v1143_v47 = vadd.f32 %v2665_v48, %v1123_v37  ;;  %v1148_v48 = vld [vmem:[%s3029_s2 + $0x10] sm:$0xff] }
 0x2b2   : > { %v1147_v24 = vmax.f32 %v1143_v47, 0.0 }
 0x2b4   : > { %1180 = vmatpush.msra.mxu1 %v1147_v24 }
 0x2b6   : > { %1181 = vmatpush.msra.mxu1 %v1146_v49 }
 0x2b8   : > { %1182 = vmatpush.msra.mxu1 %v1145_v12 }
 0x2ba   : > { %1183 = vmatpush.msra.mxu1 %v1144_v58 }
 0x2bb   : > { %1722 = vmatmul.msk.f32.vlgmr.msra.gmra.mxu1 %vm493_vm0, %v1148_v48 }
 0x2bd   : > { %v1394_v46 = vpop.f32.mrf.mxu0 }
 0x2be   : > { %v1395_v52 = vadd.f32 %v1394_v46, %v1364_v9 }
 0x2c0   : > { %v1402_v0 = vmul.f32 0.3, %v1395_v52 }
 0x2c2   : > { %v1404_v13 = vadd.f32 %v1402_v0, %v1400_v39 }
 0x2c3   : > { %1723 = vmatmul.msk.f32.gmra.mxu1 %vm493_vm0, %v1149_v60 }
 0x2c4   : > { %1406 = vst [vmem:[%s2865_s29] sm:$0xff] %v1404_v13 }
 0x2c5   : > { %v1397_v29 = vpop.f32.mrf.mxu0 }
 0x2c6   : > { %v1398_v16 = vadd.f32 %v1397_v29, %v1369_v35 }
 0x2c8   : > { %v1403_v31 = vmul.f32 0.3, %v1398_v16 }
 0x2ca   : > { %v1405_v62 = vadd.f32 %v1403_v31, %v1401_v40 }
 0x2cb   : > { %2002 = shalt.err (!%p1999_p12)
}
 0x2cc   : > { %1757 = dma.vmem_to_hbm [thread:$0]  (%p2309_p8), %s1455_s25, 128, %s1457_s27, %s2880_s26   ;;  %1407 = vst [vmem:[%s2865_s29 + $0x8] sm:$0xff] %v1405_v62 }
 0x2cd   : > { %s1438_s0 = sshll.u32 %s2807_s1, 4  ;;  %s1440_s2 = sshll.u32 %s1436_s8, 4  ;;  %s1439_s0 = int_to_ptr.vmem [resolvable:$true] %s1438_s0  ;;  %s1441_s2 = int_to_ptr.hbm [resolvable:$true] %s1440_s2 }
 0x2ce   : > { %s1409_s18 = scalar_lea.sflag [#allocation5], %s2348_s23  ;;  %s2017_s13 = sshra.s32 %s1441_s2, 4  ;;  %s2018_s13 = int_to_ptr.hbm [resolvable:$true] %s2017_s13 }
 0x2cf   : > { %s2019_s19 = scalar_lea.hbm %s2018_s13, 8  ;;  %s2023_s22 = scalar_lea.hbm %s2988_s6, 32 }
 0x2d0   : > { %p2020_p13 = scmp.ne.s32.totalorder %s2018_s13, %s2019_s19  ;;  %p2024_p2 = scmp.lt.s32.totalorder %s2018_s13, %s2988_s6 }
 0x2d1   : > { %p2025_p4 = scmp.lt.s32.totalorder %s2023_s22, %s2019_s19 }
 0x2d2   : > { %p2021_p0 = pnand %p2020_p13, %p2309_p8 }
 0x2d3   : > { %p2026_p3 = por %p2025_p4, %p2024_p2 }
 0x2d4   : > { %p2022_p1 = pneg %p2021_p0 }
 0x2d6   : > { %p2027_p5 = pnand %p2026_p3, %p2022_p1 }
 0x2d8   : > { %2030 = shalt.err (!%p2027_p5)
}
 0x2d9   : > { %1756 = dma.vmem_to_hbm [thread:$0]  (%p2309_p8), %s1439_s0, 128, %s1441_s2, %s1409_s18  }
 0x2da   : > { %s1739_s1 = sshll.u32 %s2873_s30, 3  ;;  %s3037_s27 = sshll.u32 %s2865_s29, 4  ;;  %s1488_s27 = int_to_ptr.vmem [resolvable:$true] %s3037_s27 }
 0x2db   : > { %s1486_s20 = scalar_lea.hbm %s2991_s9, %s1739_s1  ;;  %s1424_s19 = scalar_lea.sflag [#allocation11], %s2348_s23 }
 0x2dc   : > { %s1489_s13 = sshll.u32 %s1486_s20, 4  ;;  %s2051_s29 = scalar_lea.hbm %s2991_s9, 64  ;;  %s1490_s13 = int_to_ptr.hbm [resolvable:$true] %s1489_s13 }
 0x2dd   : > { %s2045_s12 = sshra.s32 %s1490_s13, 4  ;;  %s2046_s12 = int_to_ptr.hbm [resolvable:$true] %s2045_s12 }
 0x2de   : > { %s2047_s17 = scalar_lea.hbm %s2046_s12, 16  ;;  %p2052_p11 = scmp.lt.s32.totalorder %s2046_s12, %s2991_s9 }
 0x2df   : > { %p2048_p6 = scmp.ne.s32.totalorder %s2046_s12, %s2047_s17  ;;  %p2053_p12 = scmp.lt.s32.totalorder %s2051_s29, %s2047_s17 }
 0x2e1   : > { %p2049_p7 = pnand %p2048_p6, %p2309_p8  ;;  %p2054_p13 = por %p2053_p12, %p2052_p11 }
 0x2e3   : > { %p2050_p10 = pneg %p2049_p7 }
 0x2e5   : > { %p2055_p0 = pnand %p2054_p13, %p2050_p10 }
 0x2e7   : > { %2058 = shalt.err (!%p2055_p0)
}
 0x2e8   : > { %s2190_s28 = smov 128   ;;  %s2191_s21 = smov 256   ;;  %v1191_v21 = vmul.f32 2.0, %v2716_v38  ;;  %v1160_v27 = vpop.permute.xlu1 %1159  ;;  %v1192_v59 = vmul.f32 2.0, %v2767_v2 }
 0x2e9   : > { %s2192_s25 = smov 8   ;;  %s3038_s8 = sshll.u32 %s2348_s23, 4 }
 0x2ea   : > { %1759 = dma.vmem_to_hbm [thread:$0]  (%p2309_p8), %s1488_s27, 256, %s1490_s13, %s1424_s19, %s2190_s28, %s2191_s21, %s2192_s25  }
 0x2eb   : > { %s439_s20 = scalar_lea.vmem [#allocation9], %s3038_s8  ;;  %s3039_s22 = sld [smem:[#allocation24_spill]] }
 0x2ec   : > { %s1469_s27 = sshll.u32 %s439_s20, 4  ;;  %s1470_s27 = int_to_ptr.vmem [resolvable:$true] %s1469_s27 }
 0x2f1   : > { %s1468_s0 = scalar_lea.hbm %s3039_s22, %s1739_s1  ;;  %s2079_s29 = scalar_lea.hbm %s3039_s22, 64 }
 0x2f2   : > { %s1471_s13 = sshll.u32 %s1468_s0, 4  ;;  %s1472_s13 = int_to_ptr.hbm [resolvable:$true] %s1471_s13 }
 0x2f3   : > { %s2073_s23 = sshra.s32 %s1472_s13, 4  ;;  %s2074_s23 = int_to_ptr.hbm [resolvable:$true] %s2073_s23 }
 0x2f4   : > { %s2075_s30 = scalar_lea.hbm %s2074_s23, 16  ;;  %p2080_p3 = scmp.lt.s32.totalorder %s2074_s23, %s3039_s22 }
 0x2f5   : > { %p2076_p1 = scmp.ne.s32.totalorder %s2074_s23, %s2075_s30  ;;  %p2081_p5 = scmp.lt.s32.totalorder %s2079_s29, %s2075_s30 }
 0x2f7   : > { %p2077_p2 = pnand %p2076_p1, %p2309_p8  ;;  %p2082_p6 = por %p2081_p5, %p2080_p3 }
 0x2f9   : > { %p2078_p4 = pneg %p2077_p2 }
 0x2fb   : > { %p2083_p7 = pnand %p2082_p6, %p2078_p4 }
 0x338   : > { %v1185_v19 = vpop.f32.mrf.mxu1 }
 0x339   : > { %v1186_v28 = vadd.f32 %v1185_v19, %v2845_v30 }
 0x33b   : > { %v1193_v33 = vmul.f32 0.3, %v1186_v28 }
 0x33d   : > { %v1195_v11 = vadd.f32 %v1193_v33, %v1191_v21 }
 0x33f   : > { %1197 = vst [vmem:[%s439_s20] sm:$0xff] %v1195_v11 }
 0x340   : > { %v1188_v15 = vpop.f32.mrf.mxu1 }
 0x341   : > { %v1189_v20 = vadd.f32 %v1188_v15, %v1160_v27 }
 0x343   : > { %v1194_v1 = vmul.f32 0.3, %v1189_v20 }
 0x345   : > { %v1196_v38 = vadd.f32 %v1194_v1, %v1192_v59 }
 0x347   : > { %1198 = vst [vmem:[%s439_s20 + $0x8] sm:$0xff] %v1196_v38 }
 0x348   : > { %2086 = shalt.err (!%p2083_p7)
}
 0x349   : > { %1758 = dma.vmem_to_hbm [thread:$0]  (%p2309_p8), %s1470_s27, 256, %s1472_s13, %s2880_s26, %s2190_s28, %s2191_s21, %s2192_s25  }
 0x34a PF: > { %s3040_s8 = sld [smem:[#allocation16_spill]]  ;;  %p1783_p10 = scmp.ge.s32.totalorder %s2165_s16, 2 }
 0x34c   : > { %p1769_p11 = pnand %p1783_p10, %p2313_p9 }
 0x34e   : > { %p1770_p12 = pneg %p1769_p11 }
 0x350   : > { %s1504_s12 = sand.u32 1, %s3040_s8  }
 0x351   : > { %s1505_s17 = scalar_lea.sflag [#allocation5], %s1504_s12 }
 0x352   : > { %2124 = dma.done.wait (%p1770_p12), %s1505_s17, 128  }
 0x353   : > { %2126 = vsyncadd (%p1770_p12), %s1505_s17, 4294967168  ;;  %s3042_s0 = sadd.s32 4294967294, %s2165_s16  }
 0x354   : > { %s1514_s24 = sand.u32 1, %s3042_s0  }
 0x355   : > { %s1515_s23 = scalar_lea.sflag [#allocation8], %s1514_s24 }
 0x356   : > { %2128 = dma.done.wait (%p1770_p12), %s1515_s23, 384  }
 0x357   : > { %2130 = vsyncadd (%p1770_p12), %s1515_s23, 4294966912  ;;  %s1535_s30 = scalar_lea.sflag [#allocation11], %s1504_s12 }
 0x358   : > { %2132 = dma.done.wait (%p1770_p12), %s1535_s30, 256  }
 0x359   : > { %2134 = vsyncadd (%p1770_p12), %s1535_s30, 4294967040  ;;  %s30_s16 = sadd.s32 1, %s2165_s16   ;;  %s3043_s26 = sld [smem:[#allocation20_spill]] }
 0x35a   : > { %p27_p8 = scmp.ge.s32.totalorder %s30_s16, 6   ;;  %s3044_s28 = sld [smem:[#allocation17_spill]] }
 0x35b   : > { %s3045_s21 = sld [smem:[#allocation18_spill]]  ;;  %s3046_s30 = smov %s2141_s10 }
 0x35c   : > { %s3047_s10 = smov %s2145_s11  ;;  %s3049_s12 = smov %s2157_s14 }
 0x35d   : > { %s3050_s13 = smov %s2161_s15  ;;  %29 = sbr.rel (!%p27_p8) target bundleno = 15 (0xf), region = 179 }
 0x35f   : > { %s3048_s11 = smov %s3043_s26 }
 0x360   : > { %s3051_s14 = smov %s3044_s28 }
 0x361   : > { %s3052_s15 = smov %s3045_s21 }
 0x362   :  { %1541 = vsyncpa [#allocation4], 1 }
 0x363   :  { %1543 = vsyncpa [#allocation4 + $0x1], 1 }
 0x364   :  { %1544 = vsyncpa [#allocation5], 1 }
 0x365   :  { %1546 = vsyncpa [#allocation5 + $0x1], 1 }
 0x366   :  { %1547 = vsyncpa [#allocation8], 1 }
 0x367   :  { %1549 = vsyncpa [#allocation8 + $0x1], 1 }
 0x368   :  { %1550 = vsyncpa [#allocation11], 1 }
 0x369   :  { %1552 = vsyncpa [#allocation11 + $0x1], 1 }

</bundles_post_ra>
